<compile_context>
chip_gen: v7x
topology: tpu7x:2x2x1
jax: 0.10.0
libtpu: 0.0.40
codegen_flags: <defaults>
</compile_context>

<pallas_src>
import jax
import jax.numpy as jnp
from jax.experimental import pallas as pl
from jax.experimental.pallas import tpu as pltpu

EPS = 1e-5


def _bn_hardswish(x, gamma, beta):
    """Training-mode BatchNorm1d (biased batch stats per channel) + HardSwish.

    Works for 2-D (rows, C) or 3-D (B, L, C) inputs; stats are taken over all
    axes except the channel axis (matches PyTorch's (N, W) reduction).
    """
    C = x.shape[-1]
    g = gamma.reshape((1,) * (x.ndim - 1) + (C,))
    b = beta.reshape((1,) * (x.ndim - 1) + (C,))
    axes = tuple(range(x.ndim - 1))
    mean = jnp.mean(x, axis=axes, keepdims=True)
    var = jnp.mean(jnp.square(x - mean), axis=axes, keepdims=True)
    y = (x - mean) * jax.lax.rsqrt(var + EPS) * g + b
    return y * jnp.clip(y + 3.0, 0.0, 6.0) * (1.0 / 6.0)       # HardSwish


def _maxpool1d(x, kernel, stride, pad):
    """PyTorch MaxPool1d over the length axis of a (B, L, C) value.

    Vectorized: pad with -inf, take `kernel` shifted contiguous slabs combined
    with jnp.maximum (dense stride-1 result), then select the stride-`stride`
    output rows with static unit slices + one concat.
    """
    B, L, C = x.shape
    Lout = (L + 2 * pad - kernel) // stride + 1
    if pad > 0:
        neg = jnp.full((B, pad, C), -jnp.inf, x.dtype)
        xp = jnp.concatenate([neg, x, neg], axis=1)            # (B, L + 2p, C)
    else:
        xp = x
    nd = L + 2 * pad - (kernel - 1)                            # dense windows
    dense = xp[:, 0:nd, :]
    for k in range(1, kernel):
        dense = jnp.maximum(dense, xp[:, k:k + nd, :])
    if stride == 1 and Lout == nd:
        return dense
    return jnp.concatenate(
        [dense[:, stride * t:stride * t + 1, :] for t in range(Lout)], axis=1)


def bcn_kernel(xcol_ref, w1_ref, g1_ref, b1_ref, w2_ref, g2_ref, b2_ref,
               wfc_ref, bfc_ref, out_ref):
    K1, B, L1, C = xcol_ref.shape          # (8, B, L1, 64)
    K2 = w2_ref.shape[0] // C              # 8

    # ---- conv1: depthwise, kernel 8, stride 5, pad 2 ----
    # im2col was hoisted to the wrapper -> 8 full-tensor FMAs on (B, L1, C).
    h1 = xcol_ref[0] * w1_ref[0]
    for k in range(1, K1):
        h1 = h1 + xcol_ref[k] * w1_ref[k]

    # ---- BatchNorm1d (training batch stats) + HardSwish ----
    h1 = _bn_hardswish(h1, g1_ref[...], b1_ref[...])

    # channel_shuffle(groups=4) is folded into conv2's input-channel order
    # (done on the weights in the wrapper) — pooling is per-channel so it
    # commutes with the shuffle.

    # ---- MaxPool1d(kernel=3, stride=3, padding=1) ----
    p1 = _maxpool1d(h1, kernel=3, stride=3, pad=1)             # (B, L2, C)
    L2 = p1.shape[1]
    L3 = (L2 + 2 * 2 - K2) // 5 + 1

    # ---- conv2: dense, kernel 8, stride 5, pad 2 — ONE im2col MXU matmul ----
    zc = jnp.zeros((B, 2, C), jnp.float32)
    p1pad = jnp.concatenate([zc, p1, zc], axis=1)              # (B, L2 + 4, C)
    nd = L2 + 4 - (K2 - 1)
    # im2col: lane-concat of the 8 contiguous tap slabs -> (B, nd, K2*C)
    a = jnp.concatenate([p1pad[:, k:k + nd, :] for k in range(K2)], axis=-1)
    # keep only the stride-5 output positions -> (B, L3, K2*C)
    a = jnp.concatenate([a[:, 5 * t:5 * t + 1, :] for t in range(L3)], axis=1)
    # flatten (B, L3) rows with a sublane concat (no reshape needed).
    # NOTE: B is unrolled here — fine for the small demo batch; a large-batch
    # deployment would add a batch-tile grid axis instead.
    a_rows = jnp.concatenate([a[b] for b in range(B)], axis=0)  # (B*L3, K2*C)
    h2 = jnp.dot(a_rows, w2_ref[...],
                 preferred_element_type=jnp.float32)            # (B*L3, C)

    # ---- BatchNorm1d + HardSwish (stats over B*L3 rows == PyTorch (N, W)) ----
    h2 = _bn_hardswish(h2, g2_ref[...], b2_ref[...])
    h2 = jnp.stack([h2[b * L3:(b + 1) * L3] for b in range(B)], axis=0)  # (B,L3,C)

    # ---- MaxPool1d(kernel=4, stride=3, padding=1), then mean over length ----
    p2 = _maxpool1d(h2, kernel=4, stride=3, pad=1)             # (B, L4, C)
    feat = jnp.mean(p2, axis=1)                                # (B, C)

    # ---- fc2 ----
    out_ref[...] = (jnp.dot(feat, wfc_ref[...],
                            preferred_element_type=jnp.float32) + bfc_ref[...])


def init_params(key, d_dim=16, out_ch=64, num_classes=10):
    ks = jax.random.split(key, 9)
    return {
        "embed":   jax.random.normal(ks[0], (300, d_dim), jnp.float32),
        "w_conv1": 0.2 * jax.random.normal(ks[1], (out_ch, 1, 8), jnp.float32),
        "bn1_g":   1.0 + 0.1 * jax.random.normal(ks[2], (out_ch,), jnp.float32),
        "bn1_b":   0.1 * jax.random.normal(ks[3], (out_ch,), jnp.float32),
        "w_conv2": 0.05 * jax.random.normal(ks[4], (out_ch, out_ch, 8), jnp.float32),
        "bn2_g":   1.0 + 0.1 * jax.random.normal(ks[5], (out_ch,), jnp.float32),
        "bn2_b":   0.1 * jax.random.normal(ks[6], (out_ch,), jnp.float32),
        "w_fc":    0.1 * jax.random.normal(ks[7], (num_classes, out_ch), jnp.float32),
        "b_fc":    0.01 * jax.random.normal(ks[8], (num_classes,), jnp.float32),
    }


def bcn_forward(tokens, params, d_dim=16, out_ch=64, num_classes=10):
    B, L = tokens.shape
    cm = out_ch // d_dim                        # depthwise channel multiplier (4)
    K1 = K2 = 8
    # output lengths (PyTorch conv/pool formulas)
    L1 = (L + 2 * 2 - K1) // 5 + 1              # conv1
    L2 = (L1 + 2 * 1 - 3) // 3 + 1              # maxpool1
    L3 = (L2 + 2 * 2 - K2) // 5 + 1             # conv2
    L4 = (L3 + 2 * 1 - 4) // 3 + 1              # maxpool2
    assert L3 >= 1 and L4 >= 1, "sequence too short for this stack"

    # --- glue: embedding gather, channels-last layout, depthwise channel
    #     repeat (out channel o <- input channel o // cm), conv1 zero pad,
    #     and the conv1 im2col (strided gather done by XLA, not in-kernel) ---
    emb = params["embed"][tokens]                               # (B, L, d_dim)
    xrep = jnp.repeat(emb, cm, axis=-1)                         # (B, L, out_ch)
    xpad = jnp.pad(xrep, ((0, 0), (2, 2), (0, 0)))              # (B, L+4, out_ch)
    xcol = jnp.stack(
        [xpad[:, k:k + 5 * (L1 - 1) + 1:5, :] for k in range(K1)],
        axis=0)                                                 # (K1, B, L1, C)

    # conv1 depthwise taps laid out (k, 1, 1, out_ch) for direct broadcast
    w1 = jnp.transpose(params["w_conv1"][:, 0, :], (1, 0)).reshape(K1, 1, 1, out_ch)

    # fold channel_shuffle(groups=4) into conv2's input-channel ordering:
    # unshuffled channel j corresponds to original conv2 input channel perm[j]
    cpg = out_ch // 4
    perm = jnp.array([(c % cpg) * 4 + c // cpg for c in range(out_ch)],
                     dtype=jnp.int32)
    w2 = jnp.transpose(params["w_conv2"], (2, 1, 0))[:, perm, :]    # (K2, Cin, Cout)
    w2flat = w2.reshape(K2 * out_ch, out_ch)                        # (K2*Cin, Cout)

    g1 = params["bn1_g"].reshape(1, out_ch)
    b1 = params["bn1_b"].reshape(1, out_ch)
    g2 = params["bn2_g"].reshape(1, out_ch)
    b2 = params["bn2_b"].reshape(1, out_ch)
    wfc = jnp.transpose(params["w_fc"], (1, 0))                 # (out_ch, classes)
    bfc = params["b_fc"].reshape(1, num_classes)

    inputs = (xcol, w1, g1, b1, w2flat, g2, b2, wfc, bfc)

    def full_spec(shape):
        return pl.BlockSpec(shape, lambda i, _n=len(shape): (0,) * _n)

    out = pl.pallas_call(
        bcn_kernel,
        out_shape=jax.ShapeDtypeStruct((B, num_classes), jnp.float32),
        grid=(1,),
        in_specs=[full_spec(a.shape) for a in inputs],
        out_specs=full_spec((B, num_classes)),
        compiler_params=pltpu.CompilerParams(
            dimension_semantics=("arbitrary",)),
    )(*inputs)

    # Module default state is training -> return logits.
    # TODO(synk): eval-mode branch would be jnp.argmax(jax.nn.softmax(out,-1),1).
    return out


if __name__ == "__main__":
    key = jax.random.PRNGKey(0)
    pkey, xkey = jax.random.split(key)
    B, L = 2, 200                # batch=2, max_byte_len=200
    num_classes = 10
    params = init_params(pkey, d_dim=16, out_ch=64, num_classes=num_classes)
    tokens = jax.random.randint(xkey, (B, L), 0, 300, dtype=jnp.int32)

    logits = bcn_forward(tokens, params, d_dim=16, out_ch=64,
                         num_classes=num_classes)
    logits = jax.block_until_ready(logits)

    assert logits.shape == (B, num_classes)
    assert bool(jnp.all(jnp.isfinite(logits)))
    print("KERNEL_OK")
</pallas_src>

<mosaic_0001>
module attributes {stable_mosaic.version = 11 : i64} {
  func.func @bcn_kernel(%arg0: i32, %arg1: memref<8x2x40x64xf32, #tpu.memory_space<vmem>>, %arg2: memref<8x1x1x64xf32, #tpu.memory_space<vmem>>, %arg3: memref<1x64xf32, #tpu.memory_space<vmem>>, %arg4: memref<1x64xf32, #tpu.memory_space<vmem>>, %arg5: memref<512x64xf32, #tpu.memory_space<vmem>>, %arg6: memref<1x64xf32, #tpu.memory_space<vmem>>, %arg7: memref<1x64xf32, #tpu.memory_space<vmem>>, %arg8: memref<64x10xf32, #tpu.memory_space<vmem>>, %arg9: memref<1x10xf32, #tpu.memory_space<vmem>>, %arg10: memref<2x10xf32, #tpu.memory_space<vmem>>) attributes {dimension_semantics = [#tpu.dimension_semantics<arbitrary>], iteration_bounds = array<i64: 1>, scalar_prefetch = 0 : i64, scratch_operands = 0 : i64, tpu.core_type = #tpu.core_type<tc>, window_params = [{pipeline_mode = #tpu.pipeline_mode<synchronous>, transform_indices = @transform_0, window_bounds = array<i64: 8, 2, 40, 64>}, {pipeline_mode = #tpu.pipeline_mode<synchronous>, transform_indices = @transform_1, window_bounds = array<i64: 8, 1, 1, 64>}, {pipeline_mode = #tpu.pipeline_mode<synchronous>, transform_indices = @transform_2, window_bounds = array<i64: 1, 64>}, {pipeline_mode = #tpu.pipeline_mode<synchronous>, transform_indices = @transform_3, window_bounds = array<i64: 1, 64>}, {pipeline_mode = #tpu.pipeline_mode<synchronous>, transform_indices = @transform_4, window_bounds = array<i64: 512, 64>}, {pipeline_mode = #tpu.pipeline_mode<synchronous>, transform_indices = @transform_5, window_bounds = array<i64: 1, 64>}, {pipeline_mode = #tpu.pipeline_mode<synchronous>, transform_indices = @transform_6, window_bounds = array<i64: 1, 64>}, {pipeline_mode = #tpu.pipeline_mode<synchronous>, transform_indices = @transform_7, window_bounds = array<i64: 64, 10>}, {pipeline_mode = #tpu.pipeline_mode<synchronous>, transform_indices = @transform_8, window_bounds = array<i64: 1, 10>}, {pipeline_mode = #tpu.pipeline_mode<synchronous>, transform_indices = @transform_9, window_bounds = array<i64: 2, 10>}]} {
    %c0 = arith.constant 0 : index
    %c0_0 = arith.constant 0 : index
    %c0_1 = arith.constant 0 : index
    %c0_2 = arith.constant 0 : index
    %0 = vector.load %arg1[%c0, %c0_0, %c0_1, %c0_2] : memref<8x2x40x64xf32, #tpu.memory_space<vmem>>, vector<1x2x40x64xf32>
    %1 = vector.shape_cast %0 : vector<1x2x40x64xf32> to vector<2x40x64xf32>
    %c0_3 = arith.constant 0 : index
    %c0_4 = arith.constant 0 : index
    %c0_5 = arith.constant 0 : index
    %c0_6 = arith.constant 0 : index
    %2 = vector.load %arg2[%c0_3, %c0_4, %c0_5, %c0_6] : memref<8x1x1x64xf32, #tpu.memory_space<vmem>>, vector<1x1x1x64xf32>
    %3 = vector.shape_cast %2 : vector<1x1x1x64xf32> to vector<1x1x64xf32>
    %4 = vector.broadcast %3 : vector<1x1x64xf32> to vector<2x40x64xf32>
    %5 = arith.mulf %1, %4 : vector<2x40x64xf32>
    %c1 = arith.constant 1 : index
    %c0_7 = arith.constant 0 : index
    %c0_8 = arith.constant 0 : index
    %c0_9 = arith.constant 0 : index
    %6 = vector.load %arg1[%c1, %c0_7, %c0_8, %c0_9] : memref<8x2x40x64xf32, #tpu.memory_space<vmem>>, vector<1x2x40x64xf32>
    %7 = vector.shape_cast %6 : vector<1x2x40x64xf32> to vector<2x40x64xf32>
    %c1_10 = arith.constant 1 : index
    %c0_11 = arith.constant 0 : index
    %c0_12 = arith.constant 0 : index
    %c0_13 = arith.constant 0 : index
    %8 = vector.load %arg2[%c1_10, %c0_11, %c0_12, %c0_13] : memref<8x1x1x64xf32, #tpu.memory_space<vmem>>, vector<1x1x1x64xf32>
    %9 = vector.shape_cast %8 : vector<1x1x1x64xf32> to vector<1x1x64xf32>
    %10 = vector.broadcast %9 : vector<1x1x64xf32> to vector<2x40x64xf32>
    %11 = arith.mulf %7, %10 : vector<2x40x64xf32>
    %12 = arith.addf %5, %11 : vector<2x40x64xf32>
    %c2 = arith.constant 2 : index
    %c0_14 = arith.constant 0 : index
    %c0_15 = arith.constant 0 : index
    %c0_16 = arith.constant 0 : index
    %13 = vector.load %arg1[%c2, %c0_14, %c0_15, %c0_16] : memref<8x2x40x64xf32, #tpu.memory_space<vmem>>, vector<1x2x40x64xf32>
    %14 = vector.shape_cast %13 : vector<1x2x40x64xf32> to vector<2x40x64xf32>
    %c2_17 = arith.constant 2 : index
    %c0_18 = arith.constant 0 : index
    %c0_19 = arith.constant 0 : index
    %c0_20 = arith.constant 0 : index
    %15 = vector.load %arg2[%c2_17, %c0_18, %c0_19, %c0_20] : memref<8x1x1x64xf32, #tpu.memory_space<vmem>>, vector<1x1x1x64xf32>
    %16 = vector.shape_cast %15 : vector<1x1x1x64xf32> to vector<1x1x64xf32>
    %17 = vector.broadcast %16 : vector<1x1x64xf32> to vector<2x40x64xf32>
    %18 = arith.mulf %14, %17 : vector<2x40x64xf32>
    %19 = arith.addf %12, %18 : vector<2x40x64xf32>
    %c3 = arith.constant 3 : index
    %c0_21 = arith.constant 0 : index
    %c0_22 = arith.constant 0 : index
    %c0_23 = arith.constant 0 : index
    %20 = vector.load %arg1[%c3, %c0_21, %c0_22, %c0_23] : memref<8x2x40x64xf32, #tpu.memory_space<vmem>>, vector<1x2x40x64xf32>
    %21 = vector.shape_cast %20 : vector<1x2x40x64xf32> to vector<2x40x64xf32>
    %c3_24 = arith.constant 3 : index
    %c0_25 = arith.constant 0 : index
    %c0_26 = arith.constant 0 : index
    %c0_27 = arith.constant 0 : index
    %22 = vector.load %arg2[%c3_24, %c0_25, %c0_26, %c0_27] : memref<8x1x1x64xf32, #tpu.memory_space<vmem>>, vector<1x1x1x64xf32>
    %23 = vector.shape_cast %22 : vector<1x1x1x64xf32> to vector<1x1x64xf32>
    %24 = vector.broadcast %23 : vector<1x1x64xf32> to vector<2x40x64xf32>
    %25 = arith.mulf %21, %24 : vector<2x40x64xf32>
    %26 = arith.addf %19, %25 : vector<2x40x64xf32>
    %c4 = arith.constant 4 : index
    %c0_28 = arith.constant 0 : index
    %c0_29 = arith.constant 0 : index
    %c0_30 = arith.constant 0 : index
    %27 = vector.load %arg1[%c4, %c0_28, %c0_29, %c0_30] : memref<8x2x40x64xf32, #tpu.memory_space<vmem>>, vector<1x2x40x64xf32>
    %28 = vector.shape_cast %27 : vector<1x2x40x64xf32> to vector<2x40x64xf32>
    %c4_31 = arith.constant 4 : index
    %c0_32 = arith.constant 0 : index
    %c0_33 = arith.constant 0 : index
    %c0_34 = arith.constant 0 : index
    %29 = vector.load %arg2[%c4_31, %c0_32, %c0_33, %c0_34] : memref<8x1x1x64xf32, #tpu.memory_space<vmem>>, vector<1x1x1x64xf32>
    %30 = vector.shape_cast %29 : vector<1x1x1x64xf32> to vector<1x1x64xf32>
    %31 = vector.broadcast %30 : vector<1x1x64xf32> to vector<2x40x64xf32>
    %32 = arith.mulf %28, %31 : vector<2x40x64xf32>
    %33 = arith.addf %26, %32 : vector<2x40x64xf32>
    %c5 = arith.constant 5 : index
    %c0_35 = arith.constant 0 : index
    %c0_36 = arith.constant 0 : index
    %c0_37 = arith.constant 0 : index
    %34 = vector.load %arg1[%c5, %c0_35, %c0_36, %c0_37] : memref<8x2x40x64xf32, #tpu.memory_space<vmem>>, vector<1x2x40x64xf32>
    %35 = vector.shape_cast %34 : vector<1x2x40x64xf32> to vector<2x40x64xf32>
    %c5_38 = arith.constant 5 : index
    %c0_39 = arith.constant 0 : index
    %c0_40 = arith.constant 0 : index
    %c0_41 = arith.constant 0 : index
    %36 = vector.load %arg2[%c5_38, %c0_39, %c0_40, %c0_41] : memref<8x1x1x64xf32, #tpu.memory_space<vmem>>, vector<1x1x1x64xf32>
    %37 = vector.shape_cast %36 : vector<1x1x1x64xf32> to vector<1x1x64xf32>
    %38 = vector.broadcast %37 : vector<1x1x64xf32> to vector<2x40x64xf32>
    %39 = arith.mulf %35, %38 : vector<2x40x64xf32>
    %40 = arith.addf %33, %39 : vector<2x40x64xf32>
    %c6 = arith.constant 6 : index
    %c0_42 = arith.constant 0 : index
    %c0_43 = arith.constant 0 : index
    %c0_44 = arith.constant 0 : index
    %41 = vector.load %arg1[%c6, %c0_42, %c0_43, %c0_44] : memref<8x2x40x64xf32, #tpu.memory_space<vmem>>, vector<1x2x40x64xf32>
    %42 = vector.shape_cast %41 : vector<1x2x40x64xf32> to vector<2x40x64xf32>
    %c6_45 = arith.constant 6 : index
    %c0_46 = arith.constant 0 : index
    %c0_47 = arith.constant 0 : index
    %c0_48 = arith.constant 0 : index
    %43 = vector.load %arg2[%c6_45, %c0_46, %c0_47, %c0_48] : memref<8x1x1x64xf32, #tpu.memory_space<vmem>>, vector<1x1x1x64xf32>
    %44 = vector.shape_cast %43 : vector<1x1x1x64xf32> to vector<1x1x64xf32>
    %45 = vector.broadcast %44 : vector<1x1x64xf32> to vector<2x40x64xf32>
    %46 = arith.mulf %42, %45 : vector<2x40x64xf32>
    %47 = arith.addf %40, %46 : vector<2x40x64xf32>
    %c7 = arith.constant 7 : index
    %c0_49 = arith.constant 0 : index
    %c0_50 = arith.constant 0 : index
    %c0_51 = arith.constant 0 : index
    %48 = vector.load %arg1[%c7, %c0_49, %c0_50, %c0_51] : memref<8x2x40x64xf32, #tpu.memory_space<vmem>>, vector<1x2x40x64xf32>
    %49 = vector.shape_cast %48 : vector<1x2x40x64xf32> to vector<2x40x64xf32>
    %c7_52 = arith.constant 7 : index
    %c0_53 = arith.constant 0 : index
    %c0_54 = arith.constant 0 : index
    %c0_55 = arith.constant 0 : index
    %50 = vector.load %arg2[%c7_52, %c0_53, %c0_54, %c0_55] : memref<8x1x1x64xf32, #tpu.memory_space<vmem>>, vector<1x1x1x64xf32>
    %51 = vector.shape_cast %50 : vector<1x1x1x64xf32> to vector<1x1x64xf32>
    %52 = vector.broadcast %51 : vector<1x1x64xf32> to vector<2x40x64xf32>
    %53 = arith.mulf %49, %52 : vector<2x40x64xf32>
    %54 = arith.addf %47, %53 : vector<2x40x64xf32>
    %c0_56 = arith.constant 0 : index
    %c0_57 = arith.constant 0 : index
    %55 = vector.load %arg3[%c0_56, %c0_57] : memref<1x64xf32, #tpu.memory_space<vmem>>, vector<1x64xf32>
    %c0_58 = arith.constant 0 : index
    %c0_59 = arith.constant 0 : index
    %56 = vector.load %arg4[%c0_58, %c0_59] : memref<1x64xf32, #tpu.memory_space<vmem>>, vector<1x64xf32>
    %57 = vector.shape_cast %55 : vector<1x64xf32> to vector<1x1x64xf32>
    %58 = vector.shape_cast %56 : vector<1x64xf32> to vector<1x1x64xf32>
    %cst = arith.constant dense<0.000000e+00> : vector<64xf32>
    %59 = vector.multi_reduction <add>, %54, %cst [0, 1] : vector<2x40x64xf32> to vector<64xf32>
    %60 = vector.shape_cast %59 : vector<64xf32> to vector<1x1x64xf32>
    %cst_60 = arith.constant 8.000000e+01 : f32
    %61 = vector.broadcast %cst_60 : f32 to vector<1x1x64xf32>
    %62 = arith.divf %60, %61 : vector<1x1x64xf32>
    %63 = vector.broadcast %62 : vector<1x1x64xf32> to vector<2x40x64xf32>
    %64 = arith.subf %54, %63 : vector<2x40x64xf32>
    %65 = arith.mulf %64, %64 : vector<2x40x64xf32>
    %cst_61 = arith.constant dense<0.000000e+00> : vector<64xf32>
    %66 = vector.multi_reduction <add>, %65, %cst_61 [0, 1] : vector<2x40x64xf32> to vector<64xf32>
    %67 = vector.shape_cast %66 : vector<64xf32> to vector<1x1x64xf32>
    %cst_62 = arith.constant 8.000000e+01 : f32
    %68 = vector.broadcast %cst_62 : f32 to vector<1x1x64xf32>
    %69 = arith.divf %67, %68 : vector<1x1x64xf32>
    %70 = vector.broadcast %62 : vector<1x1x64xf32> to vector<2x40x64xf32>
    %71 = arith.subf %54, %70 : vector<2x40x64xf32>
    %cst_63 = arith.constant 9.99999974E-6 : f32
    %72 = vector.broadcast %cst_63 : f32 to vector<1x1x64xf32>
    %73 = arith.addf %69, %72 : vector<1x1x64xf32>
    %74 = math.rsqrt %73 : vector<1x1x64xf32>
    %75 = vector.broadcast %74 : vector<1x1x64xf32> to vector<2x40x64xf32>
    %76 = arith.mulf %71, %75 : vector<2x40x64xf32>
    %77 = vector.broadcast %57 : vector<1x1x64xf32> to vector<2x40x64xf32>
    %78 = arith.mulf %76, %77 : vector<2x40x64xf32>
    %79 = vector.broadcast %58 : vector<1x1x64xf32> to vector<2x40x64xf32>
    %80 = arith.addf %78, %79 : vector<2x40x64xf32>
    %cst_64 = arith.constant 3.000000e+00 : f32
    %81 = vector.broadcast %cst_64 : f32 to vector<2x40x64xf32>
    %82 = arith.addf %80, %81 : vector<2x40x64xf32>
    %cst_65 = arith.constant 0.000000e+00 : f32
    %cst_66 = arith.constant 6.000000e+00 : f32
    %83 = vector.broadcast %cst_65 : f32 to vector<2x40x64xf32>
    %84 = arith.maximumf %83, %82 : vector<2x40x64xf32>
    %85 = vector.broadcast %cst_66 : f32 to vector<2x40x64xf32>
    %86 = arith.minimumf %85, %84 : vector<2x40x64xf32>
    %87 = arith.mulf %80, %86 : vector<2x40x64xf32>
    %cst_67 = arith.constant 0.166666672 : f32
    %88 = vector.broadcast %cst_67 : f32 to vector<2x40x64xf32>
    %89 = arith.mulf %87, %88 : vector<2x40x64xf32>
    %cst_68 = arith.constant 0xFF800000 : f32
    %90 = vector.broadcast %cst_68 : f32 to vector<2x1x64xf32>
    %91 = tpu.concatenate %90, %89, %90 in 1 : vector<2x1x64xf32>, vector<2x40x64xf32>, vector<2x1x64xf32> -> vector<2x42x64xf32>
    %92 = vector.extract_strided_slice %91 {offsets = [0, 0, 0], sizes = [2, 40, 64], strides = [1, 1, 1]} : vector<2x42x64xf32> to vector<2x40x64xf32>
    %93 = vector.extract_strided_slice %91 {offsets = [0, 1, 0], sizes = [2, 40, 64], strides = [1, 1, 1]} : vector<2x42x64xf32> to vector<2x40x64xf32>
    %94 = arith.maximumf %92, %93 : vector<2x40x64xf32>
    %95 = vector.extract_strided_slice %91 {offsets = [0, 2, 0], sizes = [2, 40, 64], strides = [1, 1, 1]} : vector<2x42x64xf32> to vector<2x40x64xf32>
    %96 = arith.maximumf %94, %95 : vector<2x40x64xf32>
    %97 = vector.extract_strided_slice %96 {offsets = [0, 0, 0], sizes = [2, 1, 64], strides = [1, 1, 1]} : vector<2x40x64xf32> to vector<2x1x64xf32>
    %98 = vector.extract_strided_slice %96 {offsets = [0, 3, 0], sizes = [2, 1, 64], strides = [1, 1, 1]} : vector<2x40x64xf32> to vector<2x1x64xf32>
    %99 = vector.extract_strided_slice %96 {offsets = [0, 6, 0], sizes = [2, 1, 64], strides = [1, 1, 1]} : vector<2x40x64xf32> to vector<2x1x64xf32>
    %100 = vector.extract_strided_slice %96 {offsets = [0, 9, 0], sizes = [2, 1, 64], strides = [1, 1, 1]} : vector<2x40x64xf32> to vector<2x1x64xf32>
    %101 = vector.extract_strided_slice %96 {offsets = [0, 12, 0], sizes = [2, 1, 64], strides = [1, 1, 1]} : vector<2x40x64xf32> to vector<2x1x64xf32>
    %102 = vector.extract_strided_slice %96 {offsets = [0, 15, 0], sizes = [2, 1, 64], strides = [1, 1, 1]} : vector<2x40x64xf32> to vector<2x1x64xf32>
    %103 = vector.extract_strided_slice %96 {offsets = [0, 18, 0], sizes = [2, 1, 64], strides = [1, 1, 1]} : vector<2x40x64xf32> to vector<2x1x64xf32>
    %104 = vector.extract_strided_slice %96 {offsets = [0, 21, 0], sizes = [2, 1, 64], strides = [1, 1, 1]} : vector<2x40x64xf32> to vector<2x1x64xf32>
    %105 = vector.extract_strided_slice %96 {offsets = [0, 24, 0], sizes = [2, 1, 64], strides = [1, 1, 1]} : vector<2x40x64xf32> to vector<2x1x64xf32>
    %106 = vector.extract_strided_slice %96 {offsets = [0, 27, 0], sizes = [2, 1, 64], strides = [1, 1, 1]} : vector<2x40x64xf32> to vector<2x1x64xf32>
    %107 = vector.extract_strided_slice %96 {offsets = [0, 30, 0], sizes = [2, 1, 64], strides = [1, 1, 1]} : vector<2x40x64xf32> to vector<2x1x64xf32>
    %108 = vector.extract_strided_slice %96 {offsets = [0, 33, 0], sizes = [2, 1, 64], strides = [1, 1, 1]} : vector<2x40x64xf32> to vector<2x1x64xf32>
    %109 = vector.extract_strided_slice %96 {offsets = [0, 36, 0], sizes = [2, 1, 64], strides = [1, 1, 1]} : vector<2x40x64xf32> to vector<2x1x64xf32>
    %110 = vector.extract_strided_slice %96 {offsets = [0, 39, 0], sizes = [2, 1, 64], strides = [1, 1, 1]} : vector<2x40x64xf32> to vector<2x1x64xf32>
    %111 = tpu.concatenate %97, %98, %99, %100, %101, %102, %103, %104, %105, %106, %107, %108, %109, %110 in 1 : vector<2x1x64xf32>, vector<2x1x64xf32>, vector<2x1x64xf32>, vector<2x1x64xf32>, vector<2x1x64xf32>, vector<2x1x64xf32>, vector<2x1x64xf32>, vector<2x1x64xf32>, vector<2x1x64xf32>, vector<2x1x64xf32>, vector<2x1x64xf32>, vector<2x1x64xf32>, vector<2x1x64xf32>, vector<2x1x64xf32> -> vector<2x14x64xf32>
    %cst_69 = arith.constant 0.000000e+00 : f32
    %112 = vector.broadcast %cst_69 : f32 to vector<2x2x64xf32>
    %113 = tpu.concatenate %112, %111, %112 in 1 : vector<2x2x64xf32>, vector<2x14x64xf32>, vector<2x2x64xf32> -> vector<2x18x64xf32>
    %114 = vector.extract_strided_slice %113 {offsets = [0, 0, 0], sizes = [2, 11, 64], strides = [1, 1, 1]} : vector<2x18x64xf32> to vector<2x11x64xf32>
    %115 = vector.extract_strided_slice %113 {offsets = [0, 1, 0], sizes = [2, 11, 64], strides = [1, 1, 1]} : vector<2x18x64xf32> to vector<2x11x64xf32>
    %116 = vector.extract_strided_slice %113 {offsets = [0, 2, 0], sizes = [2, 11, 64], strides = [1, 1, 1]} : vector<2x18x64xf32> to vector<2x11x64xf32>
    %117 = vector.extract_strided_slice %113 {offsets = [0, 3, 0], sizes = [2, 11, 64], strides = [1, 1, 1]} : vector<2x18x64xf32> to vector<2x11x64xf32>
    %118 = vector.extract_strided_slice %113 {offsets = [0, 4, 0], sizes = [2, 11, 64], strides = [1, 1, 1]} : vector<2x18x64xf32> to vector<2x11x64xf32>
    %119 = vector.extract_strided_slice %113 {offsets = [0, 5, 0], sizes = [2, 11, 64], strides = [1, 1, 1]} : vector<2x18x64xf32> to vector<2x11x64xf32>
    %120 = vector.extract_strided_slice %113 {offsets = [0, 6, 0], sizes = [2, 11, 64], strides = [1, 1, 1]} : vector<2x18x64xf32> to vector<2x11x64xf32>
    %121 = vector.extract_strided_slice %113 {offsets = [0, 7, 0], sizes = [2, 11, 64], strides = [1, 1, 1]} : vector<2x18x64xf32> to vector<2x11x64xf32>
    %122 = tpu.concatenate %114, %115, %116, %117, %118, %119, %120, %121 in 2 : vector<2x11x64xf32>, vector<2x11x64xf32>, vector<2x11x64xf32>, vector<2x11x64xf32>, vector<2x11x64xf32>, vector<2x11x64xf32>, vector<2x11x64xf32>, vector<2x11x64xf32> -> vector<2x11x512xf32>
    %123 = vector.extract_strided_slice %122 {offsets = [0, 0, 0], sizes = [2, 1, 512], strides = [1, 1, 1]} : vector<2x11x512xf32> to vector<2x1x512xf32>
    %124 = vector.extract_strided_slice %122 {offsets = [0, 5, 0], sizes = [2, 1, 512], strides = [1, 1, 1]} : vector<2x11x512xf32> to vector<2x1x512xf32>
    %125 = vector.extract_strided_slice %122 {offsets = [0, 10, 0], sizes = [2, 1, 512], strides = [1, 1, 1]} : vector<2x11x512xf32> to vector<2x1x512xf32>
    %126 = tpu.concatenate %123, %124, %125 in 1 : vector<2x1x512xf32>, vector<2x1x512xf32>, vector<2x1x512xf32> -> vector<2x3x512xf32>
    %127 = vector.extract_strided_slice %126 {offsets = [0, 0, 0], sizes = [1, 3, 512], strides = [1, 1, 1]} : vector<2x3x512xf32> to vector<1x3x512xf32>
    %128 = vector.shape_cast %127 : vector<1x3x512xf32> to vector<3x512xf32>
    %129 = vector.extract_strided_slice %126 {offsets = [1, 0, 0], sizes = [1, 3, 512], strides = [1, 1, 1]} : vector<2x3x512xf32> to vector<1x3x512xf32>
    %130 = vector.shape_cast %129 : vector<1x3x512xf32> to vector<3x512xf32>
    %131 = tpu.concatenate %128, %130 in 0 : vector<3x512xf32>, vector<3x512xf32> -> vector<6x512xf32>
    %c0_70 = arith.constant 0 : index
    %c0_71 = arith.constant 0 : index
    %132 = vector.load %arg5[%c0_70, %c0_71] : memref<512x64xf32, #tpu.memory_space<vmem>>, vector<512x64xf32>
    %cst_72 = arith.constant dense<0.000000e+00> : vector<6x64xf32>
    %133 = tpu.matmul %131, %132, %cst_72 {dimension_numbers = #tpu.dot_dimension_numbers<[1], [0], [0], [1], [0, 0, 1, 1], [], []>} : vector<6x512xf32>, vector<512x64xf32>, vector<6x64xf32> -> vector<6x64xf32>
    %c0_73 = arith.constant 0 : index
    %c0_74 = arith.constant 0 : index
    %134 = vector.load %arg6[%c0_73, %c0_74] : memref<1x64xf32, #tpu.memory_space<vmem>>, vector<1x64xf32>
    %c0_75 = arith.constant 0 : index
    %c0_76 = arith.constant 0 : index
    %135 = vector.load %arg7[%c0_75, %c0_76] : memref<1x64xf32, #tpu.memory_space<vmem>>, vector<1x64xf32>
    %cst_77 = arith.constant dense<0.000000e+00> : vector<64xf32>
    %136 = vector.multi_reduction <add>, %133, %cst_77 [0] : vector<6x64xf32> to vector<64xf32>
    %137 = vector.shape_cast %136 : vector<64xf32> to vector<1x64xf32>
    %cst_78 = arith.constant 6.000000e+00 : f32
    %138 = vector.broadcast %cst_78 : f32 to vector<1x64xf32>
    %139 = arith.divf %137, %138 : vector<1x64xf32>
    %140 = vector.broadcast %139 : vector<1x64xf32> to vector<6x64xf32>
    %141 = arith.subf %133, %140 : vector<6x64xf32>
    %142 = arith.mulf %141, %141 : vector<6x64xf32>
    %cst_79 = arith.constant dense<0.000000e+00> : vector<64xf32>
    %143 = vector.multi_reduction <add>, %142, %cst_79 [0] : vector<6x64xf32> to vector<64xf32>
    %144 = vector.shape_cast %143 : vector<64xf32> to vector<1x64xf32>
    %cst_80 = arith.constant 6.000000e+00 : f32
    %145 = vector.broadcast %cst_80 : f32 to vector<1x64xf32>
    %146 = arith.divf %144, %145 : vector<1x64xf32>
    %147 = vector.broadcast %139 : vector<1x64xf32> to vector<6x64xf32>
    %148 = arith.subf %133, %147 : vector<6x64xf32>
    %cst_81 = arith.constant 9.99999974E-6 : f32
    %149 = vector.broadcast %cst_81 : f32 to vector<1x64xf32>
    %150 = arith.addf %146, %149 : vector<1x64xf32>
    %151 = math.rsqrt %150 : vector<1x64xf32>
    %152 = vector.broadcast %151 : vector<1x64xf32> to vector<6x64xf32>
    %153 = arith.mulf %148, %152 : vector<6x64xf32>
    %154 = vector.broadcast %134 : vector<1x64xf32> to vector<6x64xf32>
    %155 = arith.mulf %153, %154 : vector<6x64xf32>
    %156 = vector.broadcast %135 : vector<1x64xf32> to vector<6x64xf32>
    %157 = arith.addf %155, %156 : vector<6x64xf32>
    %cst_82 = arith.constant 3.000000e+00 : f32
    %158 = vector.broadcast %cst_82 : f32 to vector<6x64xf32>
    %159 = arith.addf %157, %158 : vector<6x64xf32>
    %cst_83 = arith.constant 0.000000e+00 : f32
    %cst_84 = arith.constant 6.000000e+00 : f32
    %160 = vector.broadcast %cst_83 : f32 to vector<6x64xf32>
    %161 = arith.maximumf %160, %159 : vector<6x64xf32>
    %162 = vector.broadcast %cst_84 : f32 to vector<6x64xf32>
    %163 = arith.minimumf %162, %161 : vector<6x64xf32>
    %164 = arith.mulf %157, %163 : vector<6x64xf32>
    %cst_85 = arith.constant 0.166666672 : f32
    %165 = vector.broadcast %cst_85 : f32 to vector<6x64xf32>
    %166 = arith.mulf %164, %165 : vector<6x64xf32>
    %167 = vector.extract_strided_slice %166 {offsets = [0, 0], sizes = [3, 64], strides = [1, 1]} : vector<6x64xf32> to vector<3x64xf32>
    %168 = vector.extract_strided_slice %166 {offsets = [3, 0], sizes = [3, 64], strides = [1, 1]} : vector<6x64xf32> to vector<3x64xf32>
    %169 = vector.shape_cast %167 : vector<3x64xf32> to vector<1x3x64xf32>
    %170 = vector.shape_cast %168 : vector<3x64xf32> to vector<1x3x64xf32>
    %171 = tpu.concatenate %169, %170 in 0 : vector<1x3x64xf32>, vector<1x3x64xf32> -> vector<2x3x64xf32>
    %cst_86 = arith.constant 0xFF800000 : f32
    %172 = vector.broadcast %cst_86 : f32 to vector<2x1x64xf32>
    %173 = tpu.concatenate %172, %171, %172 in 1 : vector<2x1x64xf32>, vector<2x3x64xf32>, vector<2x1x64xf32> -> vector<2x5x64xf32>
    %174 = vector.extract_strided_slice %173 {offsets = [0, 0, 0], sizes = [2, 2, 64], strides = [1, 1, 1]} : vector<2x5x64xf32> to vector<2x2x64xf32>
    %175 = vector.extract_strided_slice %173 {offsets = [0, 1, 0], sizes = [2, 2, 64], strides = [1, 1, 1]} : vector<2x5x64xf32> to vector<2x2x64xf32>
    %176 = arith.maximumf %174, %175 : vector<2x2x64xf32>
    %177 = vector.extract_strided_slice %173 {offsets = [0, 2, 0], sizes = [2, 2, 64], strides = [1, 1, 1]} : vector<2x5x64xf32> to vector<2x2x64xf32>
    %178 = arith.maximumf %176, %177 : vector<2x2x64xf32>
    %179 = vector.extract_strided_slice %173 {offsets = [0, 3, 0], sizes = [2, 2, 64], strides = [1, 1, 1]} : vector<2x5x64xf32> to vector<2x2x64xf32>
    %180 = arith.maximumf %178, %179 : vector<2x2x64xf32>
    %181 = vector.extract_strided_slice %180 {offsets = [0, 0, 0], sizes = [2, 1, 64], strides = [1, 1, 1]} : vector<2x2x64xf32> to vector<2x1x64xf32>
    %cst_87 = arith.constant dense<0.000000e+00> : vector<2x64xf32>
    %182 = vector.multi_reduction <add>, %181, %cst_87 [1] : vector<2x1x64xf32> to vector<2x64xf32>
    %cst_88 = arith.constant 1.000000e+00 : f32
    %183 = vector.broadcast %cst_88 : f32 to vector<2x64xf32>
    %184 = arith.divf %182, %183 : vector<2x64xf32>
    %c0_89 = arith.constant 0 : index
    %c0_90 = arith.constant 0 : index
    %185 = vector.load %arg8[%c0_89, %c0_90] : memref<64x10xf32, #tpu.memory_space<vmem>>, vector<64x10xf32>
    %cst_91 = arith.constant dense<0.000000e+00> : vector<2x10xf32>
    %186 = tpu.matmul %184, %185, %cst_91 {dimension_numbers = #tpu.dot_dimension_numbers<[1], [0], [0], [1], [0, 0, 1, 1], [], []>} : vector<2x64xf32>, vector<64x10xf32>, vector<2x10xf32> -> vector<2x10xf32>
    %c0_92 = arith.constant 0 : index
    %c0_93 = arith.constant 0 : index
    %187 = vector.load %arg9[%c0_92, %c0_93] : memref<1x10xf32, #tpu.memory_space<vmem>>, vector<1x10xf32>
    %188 = vector.broadcast %187 : vector<1x10xf32> to vector<2x10xf32>
    %189 = arith.addf %186, %188 : vector<2x10xf32>
    %c0_94 = arith.constant 0 : index
    %c0_95 = arith.constant 0 : index
    %190 = vector.load %arg10[%c0_94, %c0_95] : memref<2x10xf32, #tpu.memory_space<vmem>>, vector<2x10xf32>
    tpu.vector_store %arg10[%c0_94, %c0_95], %189 {strides = array<i32>} : memref<2x10xf32, #tpu.memory_space<vmem>>, vector<2x10xf32>,
    return
  }
  func.func @transform_0(%arg0: i32) -> (i32, i32, i32, i32) {
    %c0_i32 = arith.constant 0 : i32
    %c0_i32_0 = arith.constant 0 : i32
    %c0_i32_1 = arith.constant 0 : i32
    %c0_i32_2 = arith.constant 0 : i32
    %c0_i32_3 = arith.constant 0 : i32
    return %c0_i32, %c0_i32_0, %c0_i32_1, %c0_i32_2 : i32, i32, i32, i32
  }
  func.func @transform_1(%arg0: i32) -> (i32, i32, i32, i32) {
    %c0_i32 = arith.constant 0 : i32
    %c0_i32_0 = arith.constant 0 : i32
    %c0_i32_1 = arith.constant 0 : i32
    %c0_i32_2 = arith.constant 0 : i32
    %c0_i32_3 = arith.constant 0 : i32
    return %c0_i32, %c0_i32_0, %c0_i32_1, %c0_i32_2 : i32, i32, i32, i32
  }
  func.func @transform_2(%arg0: i32) -> (i32, i32) {
    %c0_i32 = arith.constant 0 : i32
    %c0_i32_0 = arith.constant 0 : i32
    %c0_i32_1 = arith.constant 0 : i32
    return %c0_i32, %c0_i32_0 : i32, i32
  }
  func.func @transform_3(%arg0: i32) -> (i32, i32) {
    %c0_i32 = arith.constant 0 : i32
    %c0_i32_0 = arith.constant 0 : i32
    %c0_i32_1 = arith.constant 0 : i32
    return %c0_i32, %c0_i32_0 : i32, i32
  }
  func.func @transform_4(%arg0: i32) -> (i32, i32) {
    %c0_i32 = arith.constant 0 : i32
    %c0_i32_0 = arith.constant 0 : i32
    %c0_i32_1 = arith.constant 0 : i32
    return %c0_i32, %c0_i32_0 : i32, i32
  }
  func.func @transform_5(%arg0: i32) -> (i32, i32) {
    %c0_i32 = arith.constant 0 : i32
    %c0_i32_0 = arith.constant 0 : i32
    %c0_i32_1 = arith.constant 0 : i32
    return %c0_i32, %c0_i32_0 : i32, i32
  }
  func.func @transform_6(%arg0: i32) -> (i32, i32) {
    %c0_i32 = arith.constant 0 : i32
    %c0_i32_0 = arith.constant 0 : i32
    %c0_i32_1 = arith.constant 0 : i32
    return %c0_i32, %c0_i32_0 : i32, i32
  }
  func.func @transform_7(%arg0: i32) -> (i32, i32) {
    %c0_i32 = arith.constant 0 : i32
    %c0_i32_0 = arith.constant 0 : i32
    %c0_i32_1 = arith.constant 0 : i32
    return %c0_i32, %c0_i32_0 : i32, i32
  }
  func.func @transform_8(%arg0: i32) -> (i32, i32) {
    %c0_i32 = arith.constant 0 : i32
    %c0_i32_0 = arith.constant 0 : i32
    %c0_i32_1 = arith.constant 0 : i32
    return %c0_i32, %c0_i32_0 : i32, i32
  }
  func.func @transform_9(%arg0: i32) -> (i32, i32) {
    %c0_i32 = arith.constant 0 : i32
    %c0_i32_0 = arith.constant 0 : i32
    %c0_i32_1 = arith.constant 0 : i32
    return %c0_i32, %c0_i32_0 : i32, i32
  }
}

</mosaic_0001>

<bundles_post_ra>
// kernel: tpu_custom_call.1
= control target key start
LH: loop header
LB: loop body
LE: loop exit
PB: predicated region body
PF: predicated region fallthrough
CT: control target
= control target key end

     0   :  { %s2559_s0 = inlined_call_operand.vmem [shape: f32[8,2,40,64], index: 0, kind: input, shape index: {}]   ;;  %s2560_s1 = inlined_call_operand.vmem [shape: f32[8,1,1,64], index: 1, kind: input, shape index: {}]   ;;  %s2561_s2 = inlined_call_operand.vmem [shape: f32[1,64], index: 2, kind: input, shape index: {}]   ;;  %s2562_s3 = inlined_call_operand.vmem [shape: f32[1,64], index: 3, kind: input, shape index: {}]   ;;  %s2563_s4 = inlined_call_operand.vmem [shape: f32[512,64], index: 4, kind: input, shape index: {}]   ;;  %s2564_s5 = inlined_call_operand.vmem [shape: f32[1,64], index: 5, kind: input, shape index: {}]   ;;  %s2565_s6 = inlined_call_operand.vmem [shape: f32[1,64], index: 6, kind: input, shape index: {}]   ;;  %s2566_s7 = inlined_call_operand.vmem [shape: f32[64,10], index: 7, kind: input, shape index: {}]   ;;  %s2567_s8 = inlined_call_operand.vmem [shape: f32[1,10], index: 8, kind: input, shape index: {}]   ;;  %s2568_s9 = inlined_call_operand.hbm [shape: f32[2,10], index: 9, kind: output, shape index: {}]  }
   0x1   :  { %v33_v0 = vld [vmem:[%s2559_s0] sm:$0xff]  ;;  %v34_v1 = vld [vmem:[%s2559_s0 + $0x8] sm:$0xff]  ;;  %v35_v2 = vld [vmem:[%s2559_s0 + $0x10] sm:$0xff] }
   0x2   :  { %v36_v3 = vld [vmem:[%s2559_s0 + $0x18] sm:$0xff]  ;;  %v1712_v4 = vld [vmem:[%s2560_s1] ss:$0 sm:$0xff]  ;;  %v1304_v5 = vld [vmem:[%s2559_s0 + $0x50] sm:$0xff] }
   0x3   :  { %v1305_v6 = vld [vmem:[%s2559_s0 + $0x58] sm:$0xff]  ;;  %v1306_v7 = vld [vmem:[%s2559_s0 + $0x60] sm:$0xff]  ;;  %v1307_v8 = vld [vmem:[%s2559_s0 + $0x68] sm:$0xff]  ;;  %v50_v12 = vmul.f32 %v1712_v4, %v33_v0  ;;  %v51_v13 = vmul.f32 %v1712_v4, %v34_v1  ;;  %v52_v14 = vmul.f32 %v1712_v4, %v35_v2  ;;  %v53_v15 = vmul.f32 %v1712_v4, %v36_v3 }
   0x4   :  { %v37_v9 = vld [vmem:[%s2559_s0 + $0x20] sm:$0xff]  ;;  %v38_v10 = vld [vmem:[%s2559_s0 + $0x28] sm:$0xff]  ;;  %v39_v11 = vld [vmem:[%s2559_s0 + $0x30] sm:$0xff] }
   0x5   :  { %v1742_v16 = vld [vmem:[%s2560_s1 + $0x1] ss:$0 sm:$0xff]  ;;  %v1308_v17 = vld [vmem:[%s2559_s0 + $0x70] sm:$0xff]  ;;  %v1309_v18 = vld [vmem:[%s2559_s0 + $0x78] sm:$0xff]  ;;  %v54_v26 = vmul.f32 %v1712_v4, %v37_v9  ;;  %v55_v27 = vmul.f32 %v1712_v4, %v38_v10  ;;  %v56_v33 = vmul.f32 %v1712_v4, %v39_v11 }
   0x6   :  { %v1310_v19 = vld [vmem:[%s2559_s0 + $0x80] sm:$0xff]  ;;  %v79_v20 = vmul.f32 %v1742_v16, %v1304_v5  ;;  %v80_v21 = vmul.f32 %v1742_v16, %v1305_v6  ;;  %v81_v22 = vmul.f32 %v1742_v16, %v1306_v7  ;;  %v82_v23 = vmul.f32 %v1742_v16, %v1307_v8  ;;  %v1317_v25 = vld [vmem:[%s2559_s0 + $0xa8] sm:$0xff]  ;;  %v1318_v28 = vld [vmem:[%s2559_s0 + $0xb0] sm:$0xff] }
   0x7   :  { %v1316_v24 = vld [vmem:[%s2559_s0 + $0xa0] sm:$0xff]  ;;  %v1319_v29 = vld [vmem:[%s2559_s0 + $0xb8] sm:$0xff]  ;;  %v83_v34 = vmul.f32 %v1742_v16, %v1308_v17  ;;  %v84_v35 = vmul.f32 %v1742_v16, %v1309_v18  ;;  %v85_v36 = vmul.f32 %v1742_v16, %v1310_v19  ;;  %v1311_v37 = vld [vmem:[%s2559_s0 + $0x88] sm:$0xff] }
   0x8   :  { %v1774_v30 = vld [vmem:[%s2560_s1 + $0x2] ss:$0 sm:$0xff]  ;;  %v40_v31 = vld [vmem:[%s2559_s0 + $0x38] sm:$0xff]  ;;  %v1312_v38 = vld [vmem:[%s2559_s0 + $0x90] sm:$0xff]  ;;  %v89_v39 = vadd.f32 %v79_v20, %v50_v12  ;;  %v90_v40 = vadd.f32 %v80_v21, %v51_v13  ;;  %v91_v41 = vadd.f32 %v81_v22, %v52_v14  ;;  %v92_v42 = vadd.f32 %v82_v23, %v53_v15 }
   0x9   :  { %v41_v32 = vld [vmem:[%s2559_s0 + $0x40] sm:$0xff]  ;;  %v1321_v44 = vld [vmem:[%s2559_s0 + $0xc8] sm:$0xff]  ;;  %v1322_v45 = vld [vmem:[%s2559_s0 + $0xd0] sm:$0xff]  ;;  %v118_v46 = vmul.f32 %v1774_v30, %v1316_v24  ;;  %v119_v47 = vmul.f32 %v1774_v30, %v1317_v25  ;;  %v120_v48 = vmul.f32 %v1774_v30, %v1318_v28  ;;  %v121_v49 = vmul.f32 %v1774_v30, %v1319_v29 }
   0xa   :  { %v1320_v43 = vld [vmem:[%s2559_s0 + $0xc0] sm:$0xff]  ;;  %v57_v50 = vmul.f32 %v1712_v4, %v40_v31  ;;  %v58_v51 = vmul.f32 %v1712_v4, %v41_v32  ;;  %v1328_v52 = vld [vmem:[%s2559_s0 + $0xf0] sm:$0xff]  ;;  %v1329_v53 = vld [vmem:[%s2559_s0 + $0xf8] sm:$0xff]  ;;  %v86_v54 = vmul.f32 %v1742_v16, %v1311_v37  ;;  %v87_v55 = vmul.f32 %v1742_v16, %v1312_v38 }
   0xb   :  { %v93_v56 = vadd.f32 %v83_v34, %v54_v26  ;;  %v94_v57 = vadd.f32 %v84_v35, %v55_v27  ;;  %v1330_v58 = vld [vmem:[%s2559_s0 + $0x100] sm:$0xff]  ;;  %v1331_v59 = vld [vmem:[%s2559_s0 + $0x108] sm:$0xff]  ;;  %v1313_v62 = vld [vmem:[%s2559_s0 + $0x98] sm:$0xff]  ;;  %v95_v63 = vadd.f32 %v85_v36, %v56_v33  ;;  %v122_v0 = vmul.f32 %v1774_v30, %v1320_v43 }
   0xc   :  { %v1824_v60 = vld [vmem:[%s2560_s1 + $0x3] ss:$0 sm:$0xff]  ;;  %v42_v61 = vld [vmem:[%s2559_s0 + $0x48] sm:$0xff]  ;;  %v123_v1 = vmul.f32 %v1774_v30, %v1321_v44  ;;  %v124_v2 = vmul.f32 %v1774_v30, %v1322_v45  ;;  %v1323_v3 = vld [vmem:[%s2559_s0 + $0xd8] sm:$0xff]  ;;  %v128_v6 = vadd.f32 %v118_v46, %v89_v39  ;;  %v129_v7 = vadd.f32 %v119_v47, %v90_v40 }
   0xd   :  { %v1324_v5 = vld [vmem:[%s2559_s0 + $0xe0] sm:$0xff]  ;;  %v130_v8 = vadd.f32 %v120_v48, %v91_v41  ;;  %v131_v9 = vadd.f32 %v121_v49, %v92_v42  ;;  %v1332_v10 = vld [vmem:[%s2559_s0 + $0x110] sm:$0xff]  ;;  %v1333_v11 = vld [vmem:[%s2559_s0 + $0x118] sm:$0xff]  ;;  %v157_v13 = vmul.f32 %v1824_v60, %v1328_v52  ;;  %v158_v14 = vmul.f32 %v1824_v60, %v1329_v53 }
   0xe   :  { %v1334_v12 = vld [vmem:[%s2559_s0 + $0x120] sm:$0xff]  ;;  %v159_v15 = vmul.f32 %v1824_v60, %v1330_v58  ;;  %v160_v17 = vmul.f32 %v1824_v60, %v1331_v59  ;;  %v59_v18 = vmul.f32 %v1712_v4, %v42_v61  ;;  %v88_v19 = vmul.f32 %v1742_v16, %v1313_v62  ;;  %v1341_v23 = vld [vmem:[%s2559_s0 + $0x148] sm:$0xff]  ;;  %v1342_v4 = vld [vmem:[%s2559_s0 + $0x150] sm:$0xff] }
   0xf   :  { %v96_v20 = vadd.f32 %v86_v54, %v57_v50  ;;  %v97_v21 = vadd.f32 %v87_v55, %v58_v51  ;;  %v1340_v22 = vld [vmem:[%s2559_s0 + $0x140] sm:$0xff]  ;;  %v125_v24 = vmul.f32 %v1774_v30, %v1323_v3  ;;  %v126_v25 = vmul.f32 %v1774_v30, %v1324_v5  ;;  %v1343_v16 = vld [vmem:[%s2559_s0 + $0x158] sm:$0xff]  ;;  %v1325_v29 = vld [vmem:[%s2559_s0 + $0xe8] sm:$0xff] }
  0x10   :  { %v132_v26 = vadd.f32 %v122_v0, %v93_v56  ;;  %v133_v27 = vadd.f32 %v123_v1, %v94_v57  ;;  %v1873_v28 = vld [vmem:[%s2560_s1 + $0x4] ss:$0 sm:$0xff]  ;;  %v134_v31 = vadd.f32 %v124_v2, %v95_v63  ;;  %v161_v32 = vmul.f32 %v1824_v60, %v1332_v10  ;;  %v1335_v35 = vld [vmem:[%s2559_s0 + $0x128] sm:$0xff]  ;;  %v1336_v36 = vld [vmem:[%s2559_s0 + $0x130] sm:$0xff] }
  0x11   :  { %v162_v33 = vmul.f32 %v1824_v60, %v1333_v11  ;;  %v163_v34 = vmul.f32 %v1824_v60, %v1334_v12  ;;  %v167_v37 = vadd.f32 %v157_v13, %v128_v6  ;;  %v168_v38 = vadd.f32 %v158_v14, %v129_v7  ;;  %v1344_v41 = vld [vmem:[%s2559_s0 + $0x160] sm:$0xff]  ;;  %v1345_v42 = vld [vmem:[%s2559_s0 + $0x168] sm:$0xff]  ;;  %v1346_v43 = vld [vmem:[%s2559_s0 + $0x170] sm:$0xff] }
  0x12   :  { %v169_v39 = vadd.f32 %v159_v15, %v130_v8  ;;  %v170_v40 = vadd.f32 %v160_v17, %v131_v9  ;;  %v196_v44 = vmul.f32 %v1873_v28, %v1340_v22  ;;  %v197_v45 = vmul.f32 %v1873_v28, %v1341_v23  ;;  %v1352_v52 = vld [vmem:[%s2559_s0 + $0x190] sm:$0xff]  ;;  %v1353_v53 = vld [vmem:[%s2559_s0 + $0x198] sm:$0xff]  ;;  %v1355_v58 = vld [vmem:[%s2559_s0 + $0x1a8] sm:$0xff] }
  0x13   :  { %v198_v46 = vmul.f32 %v1873_v28, %v1342_v4  ;;  %v199_v47 = vmul.f32 %v1873_v28, %v1343_v16  ;;  %v98_v48 = vadd.f32 %v88_v19, %v59_v18  ;;  %v127_v49 = vmul.f32 %v1774_v30, %v1325_v29  ;;  %v1354_v30 = vld [vmem:[%s2559_s0 + $0x1a0] sm:$0xff]  ;;  %v1337_v61 = vld [vmem:[%s2559_s0 + $0x138] sm:$0xff]  ;;  %v1356_v9 = vld [vmem:[%s2559_s0 + $0x1b0] sm:$0xff] }
  0x14   :  { %v135_v50 = vadd.f32 %v125_v24, %v96_v20  ;;  %v136_v51 = vadd.f32 %v126_v25, %v97_v21  ;;  %v164_v54 = vmul.f32 %v1824_v60, %v1335_v35  ;;  %v165_v55 = vmul.f32 %v1824_v60, %v1336_v36  ;;  %v1918_v59 = vld [vmem:[%s2560_s1 + $0x5] ss:$0 sm:$0xff]  ;;  %v1347_v2 = vld [vmem:[%s2559_s0 + $0x178] sm:$0xff]  ;;  %v1365_v22 = vld [vmem:[%s2559_s0 + $0x1e8] sm:$0xff] }
  0x15   :  { %v171_v56 = vadd.f32 %v161_v32, %v132_v26  ;;  %v172_v57 = vadd.f32 %v162_v33, %v133_v27  ;;  %v173_v62 = vadd.f32 %v163_v34, %v134_v31  ;;  %v200_v63 = vmul.f32 %v1873_v28, %v1344_v41  ;;  %v1348_v3 = vld [vmem:[%s2559_s0 + $0x180] sm:$0xff]  ;;  %v1357_v10 = vld [vmem:[%s2559_s0 + $0x1b8] sm:$0xff]  ;;  %v1366_v23 = vld [vmem:[%s2559_s0 + $0x1f0] sm:$0xff] }
  0x16   :  { %v201_v0 = vmul.f32 %v1873_v28, %v1345_v42  ;;  %v202_v1 = vmul.f32 %v1873_v28, %v1346_v43  ;;  %v206_v5 = vadd.f32 %v196_v44, %v167_v37  ;;  %v207_v6 = vadd.f32 %v197_v45, %v168_v38  ;;  %v1358_v11 = vld [vmem:[%s2559_s0 + $0x1c0] sm:$0xff]  ;;  %v1367_v27 = vld [vmem:[%s2559_s0 + $0x1f8] sm:$0xff] }
  0x17   :  { %v208_v7 = vadd.f32 %v198_v46, %v169_v39  ;;  %v209_v8 = vadd.f32 %v199_v47, %v170_v40  ;;  %v235_v12 = vmul.f32 %v1918_v59, %v1352_v52  ;;  %v236_v13 = vmul.f32 %v1918_v59, %v1353_v53  ;;  %v1364_v21 = vld [vmem:[%s2559_s0 + $0x1e0] sm:$0xff] }
  0x18   :  { %v237_v14 = vmul.f32 %v1918_v59, %v1354_v30  ;;  %v238_v15 = vmul.f32 %v1918_v59, %v1355_v58  ;;  %v137_v17 = vadd.f32 %v127_v49, %v98_v48  ;;  %v166_v18 = vmul.f32 %v1824_v60, %v1337_v61  ;;  %v1963_v4 = vld [vmem:[%s2560_s1 + $0x6] ss:$0 sm:$0xff] }
  0x19   :  { %v174_v19 = vadd.f32 %v164_v54, %v135_v50  ;;  %v175_v20 = vadd.f32 %v165_v55, %v136_v51  ;;  %v203_v24 = vmul.f32 %v1873_v28, %v1347_v2  ;;  %v204_v25 = vmul.f32 %v1873_v28, %v1348_v3 }
  0x1a   :  { %v210_v26 = vadd.f32 %v200_v63, %v171_v56  ;;  %v211_v60 = vadd.f32 %v201_v0, %v172_v57 }
  0x1b   :  { %14 = vsyncpa [#allocation3], 0  ;;  %v1349_v16 = vld [vmem:[%s2559_s0 + $0x188] sm:$0xff]  ;;  %v212_v29 = vadd.f32 %v202_v1, %v173_v62  ;;  %v239_v31 = vmul.f32 %v1918_v59, %v1356_v9  ;;  %v240_v32 = vmul.f32 %v1918_v59, %v1357_v10  ;;  %v241_v33 = vmul.f32 %v1918_v59, %v1358_v11  ;;  %v1360_v35 = vld [vmem:[%s2559_s0 + $0x1d0] sm:$0xff]  ;;  %s1642_s30 = smov 64   ;;  %s1646_s22 = smov [#allocation2]  }
  0x1c   :  { %v1359_v34 = vld [vmem:[%s2559_s0 + $0x1c8] sm:$0xff]  ;;  %v245_v36 = vadd.f32 %v235_v12, %v206_v5  ;;  %v246_v37 = vadd.f32 %v236_v13, %v207_v6  ;;  %v247_v38 = vadd.f32 %v237_v14, %v208_v7  ;;  %v248_v39 = vadd.f32 %v238_v15, %v209_v8  ;;  %v1368_v40 = vld [vmem:[%s2559_s0 + $0x200] sm:$0xff]  ;;  %v1370_v50 = vld [vmem:[%s2559_s0 + $0x210] sm:$0xff]  ;;  %s1295_s23 = sshll.u32 %s1646_s22, 4  ;;  %s1296_s23 = int_to_ptr.vmem [resolvable:$true] %s1295_s23 }
  0x1d   :  { %vm335_vm0 = vcmask 523264   ;;  %v1369_v41 = vld [vmem:[%s2559_s0 + $0x208] sm:$0xff]  ;;  %v274_v42 = vmul.f32 %v1963_v4, %v1364_v21  ;;  %v275_v43 = vmul.f32 %v1963_v4, %v1365_v22  ;;  %v276_v44 = vmul.f32 %v1963_v4, %v1366_v23  ;;  %v1376_v51 = vld [vmem:[%s2559_s0 + $0x230] sm:$0xff]  ;;  %v1377_v52 = vld [vmem:[%s2559_s0 + $0x238] sm:$0xff]  ;;  %p1623_p1 = scmp.lt.s32.totalorder %s1296_s23, %s1296_s23 }
  0x1e   :  { %v277_v45 = vmul.f32 %v1963_v4, %v1367_v27  ;;  %v176_v46 = vadd.f32 %v166_v18, %v137_v17  ;;  %v205_v47 = vmul.f32 %v1873_v28, %v1349_v16  ;;  %v213_v48 = vadd.f32 %v203_v24, %v174_v19  ;;  %v1378_v56 = vld [vmem:[%s2559_s0 + $0x240] sm:$0xff]  ;;  %v1379_v57 = vld [vmem:[%s2559_s0 + $0x248] sm:$0xff]  ;;  %v1361_v58 = vld [vmem:[%s2559_s0 + $0x1d8] sm:$0xff] }
  0x1f   :  { %v214_v49 = vadd.f32 %v204_v25, %v175_v20  ;;  %v242_v53 = vmul.f32 %v1918_v59, %v1359_v34  ;;  %v243_v54 = vmul.f32 %v1918_v59, %v1360_v35  ;;  %v249_v55 = vadd.f32 %v239_v31, %v210_v26  ;;  %v1387_v30 = vld [vmem:[%s2560_s1 + $0x7] ss:$0 sm:$0xff]  ;;  %v1380_v1 = vld [vmem:[%s2559_s0 + $0x250] sm:$0xff]  ;;  %v1371_v2 = vld [vmem:[%s2559_s0 + $0x218] sm:$0xff]  ;;  %s1618_s1 = scalar_lea.vmem %s1296_s23, 32 }
  0x20   :  { %v278_v28 = vmul.f32 %v1963_v4, %v1368_v40  ;;  %v250_v61 = vadd.f32 %v240_v32, %v211_v60  ;;  %v251_v62 = vadd.f32 %v241_v33, %v212_v29  ;;  %v284_v63 = vadd.f32 %v274_v42, %v245_v36  ;;  %v1381_v8 = vld [vmem:[%s2559_s0 + $0x258] sm:$0xff]  ;;  %v1372_v15 = vld [vmem:[%s2559_s0 + $0x220] sm:$0xff]  ;;  %v1373_v24 = vld [vmem:[%s2559_s0 + $0x228] sm:$0xff]  ;;  %p1619_p0 = scmp.ne.s32.totalorder %s1296_s23, %s1618_s1  ;;  %p1624_p2 = scmp.lt.s32.totalorder %s1618_s1, %s1618_s1 }
  0x21   :  { %v285_v0 = vadd.f32 %v275_v43, %v246_v37  ;;  %v279_v3 = vmul.f32 %v1963_v4, %v1369_v41  ;;  %v280_v5 = vmul.f32 %v1963_v4, %v1370_v50  ;;  %v286_v6 = vadd.f32 %v276_v44, %v247_v38  ;;  %v1382_v18 = vld [vmem:[%s2559_s0 + $0x260] sm:$0xff]  ;;  %v1383_v31 = vld [vmem:[%s2559_s0 + $0x268] sm:$0xff] }
  0x22   :  { %v287_v7 = vadd.f32 %v277_v45, %v248_v39  ;;  %v313_v9 = vmul.f32 %v1387_v30, %v1376_v51  ;;  %v314_v10 = vmul.f32 %v1387_v30, %v1377_v52  ;;  %v315_v11 = vmul.f32 %v1387_v30, %v1378_v56  ;;  %v1384_v39 = vld [vmem:[%s2559_s0 + $0x270] sm:$0xff]  ;;  %v1385_v45 = vld [vmem:[%s2559_s0 + $0x278] sm:$0xff]  ;;  %p1625_p3 = por %p1624_p2, %p1623_p1 }
  0x23   :  { %v316_v12 = vmul.f32 %v1387_v30, %v1379_v57  ;;  %v215_v13 = vadd.f32 %v205_v47, %v176_v46  ;;  %v244_v14 = vmul.f32 %v1918_v59, %v1361_v58  ;;  %v288_v17 = vadd.f32 %v278_v28, %v249_v55 }
  0x24   :  { %v317_v19 = vmul.f32 %v1387_v30, %v1380_v1  ;;  %v252_v20 = vadd.f32 %v242_v53, %v213_v48  ;;  %v281_v21 = vmul.f32 %v1963_v4, %v1371_v2  ;;  %v323_v22 = vadd.f32 %v313_v9, %v284_v63  ;;  %p1626_p4 = pnand %p1625_p3, %p1619_p0 }
  0x25   :  { %v324_v23 = vadd.f32 %v314_v10, %v285_v0  ;;  %v289_v59 = vadd.f32 %v279_v3, %v250_v61  ;;  %v318_v25 = vmul.f32 %v1387_v30, %v1381_v8  ;;  %v325_v26 = vadd.f32 %v315_v11, %v286_v6 }
  0x26   :  { %v326_v60 = vadd.f32 %v316_v12, %v287_v7  ;;  %v253_v27 = vadd.f32 %v243_v54, %v214_v49  ;;  %v282_v16 = vmul.f32 %v1963_v4, %v1372_v15  ;;  %v290_v29 = vadd.f32 %v280_v5, %v251_v62 }
  0x27   :  { %v319_v32 = vmul.f32 %v1387_v30, %v1382_v18  ;;  %v327_v33 = vadd.f32 %v317_v19, %v288_v17  ;;  %v336_v34 = vsel %vm335_vm0, %v323_v22, 0.0  ;;  %v337_v35 = vsel %vm335_vm0, %v324_v23, 0.0 }
  0x28   :  { %v339_v36 = vsel %vm335_vm0, %v325_v26, 0.0  ;;  %v254_v37 = vadd.f32 %v244_v14, %v215_v13  ;;  %v283_v38 = vmul.f32 %v1963_v4, %v1373_v24  ;;  %v338_v40 = vadd.f32 %v337_v35, %v336_v34  ;;  %v963_v24 = vld [vmem:[%s2563_s4 + $0x180] sm:$0xff]  ;;  %v933_v34 = vld [vmem:[%s2563_s4 + $0x90] sm:$0xff] }
  0x29   :  { %v291_v41 = vadd.f32 %v281_v21, %v252_v20  ;;  %v320_v42 = vmul.f32 %v1387_v30, %v1383_v31  ;;  %v328_v43 = vadd.f32 %v318_v25, %v289_v59  ;;  %v341_v44 = vsel %vm335_vm0, %v326_v60, 0.0  ;;  %v964_v25 = vld [vmem:[%s2563_s4 + $0x188] sm:$0xff] }
  0x2a   :  { %v340_v46 = vadd.f32 %v339_v36, %v338_v40  ;;  %v292_v47 = vadd.f32 %v282_v16, %v253_v27  ;;  %v321_v48 = vmul.f32 %v1387_v30, %v1384_v39  ;;  %v329_v49 = vadd.f32 %v319_v32, %v290_v29  ;;  %v947_v32 = vld [vmem:[%s2563_s4 + $0x100] sm:$0xff]  ;;  %v966_v39 = vld [vmem:[%s2563_s4 + $0x198] sm:$0xff] }
  0x2b   :  { %v343_v4 = vsel %vm335_vm0, %v327_v33, 0.0  ;;  %v293_v51 = vadd.f32 %v283_v38, %v254_v37  ;;  %v322_v52 = vmul.f32 %v1387_v30, %v1385_v45  ;;  %v330_v53 = vadd.f32 %v320_v42, %v291_v41  ;;  %v934_v37 = vld [vmem:[%s2563_s4 + $0x98] sm:$0xff]  ;;  %v965_v38 = vld [vmem:[%s2563_s4 + $0x190] sm:$0xff] }
  0x2c   :  { %v342_v50 = vadd.f32 %v341_v44, %v340_v46  ;;  %v345_v54 = vsel %vm335_vm0, %v328_v43, 0.0  ;;  %v331_v28 = vadd.f32 %v321_v48, %v292_v47  ;;  %v347_v56 = vsel %vm335_vm0, %v329_v49, 0.0  ;;  %v917_v44 = vld [vmem:[%s2563_s4 + $0x10] sm:$0xff]  ;;  %v918_v45 = vld [vmem:[%s2563_s4 + $0x18] sm:$0xff] }
  0x2d   :  { %v2052_v58 = vadd.f32 %v322_v52, %v293_v51  ;;  %v349_v61 = vsel %vm335_vm0, %v330_v53, 0.0  ;;  %v949_v46 = vld [vmem:[%s2563_s4 + $0x110] sm:$0xff]  ;;  %v1525_v48 = vpack.c.bf16 %v964_v25, %v963_v24  ;;  %v935_v51 = vld [vmem:[%s2563_s4 + $0xa0] sm:$0xff]  ;;  %v936_v52 = vld [vmem:[%s2563_s4 + $0xa8] sm:$0xff]  ;;  %vm513_vm1 = vcmask 1040384  }
  0x2e   :  { %v344_v55 = vadd.f32 %v343_v4, %v342_v50  ;;  %v351_v63 = vsel %vm335_vm0, %v331_v28, 0.0  ;;  %v950_v50 = vld [vmem:[%s2563_s4 + $0x118] sm:$0xff]  ;;  %vm552_vm2 = vcmask 1046528   ;;  %vm595_vm3 = vcmask 1045504  }
  0x2f   :  { %v353_v1 = vsel %vm335_vm0, %v2052_v58, 0.0  ;;  %1526 = vmatprep.subr.bf16.mxu1 %v1525_v48  ;;  %vm690_vm4 = vcmask 1041408   ;;  %vm693_vm5 = vcmask 1042432   ;;  %vm696_vm6 = vcmask 1043456  }
  0x30   :  { %v346_v57 = vadd.f32 %v345_v54, %v344_v55  ;;  %v1497_v55 = vpack.c.bf16 %v934_v37, %v933_v34  ;;  %vm699_vm7 = vcmask 1044480   ;;  %vm1645_vm8 = vmmov 0  }
  0x31   :  { %vm1121_vm9 = vcmask 521216   ;;  %vm1213_vm10 = vcmask 1041409   ;;  %vm1287_vm11 = vcmask 74752  }
  0x32   :  { %v348_v62 = vadd.f32 %v347_v56, %v346_v57  ;;  %v967_v56 = vld [vmem:[%s2563_s4 + $0x1a0] sm:$0xff]  ;;  %v968_v57 = vld [vmem:[%s2563_s4 + $0x1a8] sm:$0xff] }
  0x34   :  { %v350_v0 = vadd.f32 %v349_v61, %v348_v62 }
  0x36   :  { %v352_v30 = vadd.f32 %v351_v63, %v350_v0  ;;  %v1499_v63 = vpack.c.bf16 %v918_v45, %v917_v44 }
  0x38   :  { %v354_v2 = vadd.f32 %v353_v1, %v352_v30  ;;  %v1531_v30 = vpack.c.bf16 %v950_v50, %v949_v46  ;;  %v1388_v46 = vld [vmem:[%s2561_s2] ss:$0 sm:$0xff] }
  0x39   :  { %v1389_v50 = vld [vmem:[%s2562_s3] ss:$0 sm:$0xff] }
  0x3a   :  { %v355_v3 = vrot.slane %v354_v2, 4 }
  0x3c   :  { %v356_v5 = vadd.f32 %v355_v3, %v354_v2  ;;  %v1501_v2 = vpack.c.bf16 %v936_v52, %v935_v51  ;;  %v919_v3 = vld [vmem:[%s2563_s4 + $0x20] sm:$0xff] }
  0x3e   :  { %v357_v6 = vrot.slane %v356_v5, 2 }
  0x40   :  { %v358_v7 = vadd.f32 %v357_v6, %v356_v5  ;;  %v951_v5 = vld [vmem:[%s2563_s4 + $0x120] sm:$0xff] }
  0x42   :  { %v359_v8 = vrot.slane %v358_v7, 1 }
  0x44   :  { %v360_v9 = vadd.f32 %v359_v8, %v358_v7  ;;  %v1533_v7 = vpack.c.bf16 %v968_v57, %v967_v56  ;;  %v952_v8 = vld [vmem:[%s2563_s4 + $0x128] sm:$0xff] }
  0x46   :  { %v362_v10 = vmul.f32 0.0125, %v360_v9  ;;  %v937_v9 = vld [vmem:[%s2563_s4 + $0xb0] sm:$0xff] }
  0x48   :  { %v2058_v11 = vsub.f32 %v323_v22, %v362_v10  ;;  %v2060_v12 = vsub.f32 %v324_v23, %v362_v10  ;;  %v2062_v13 = vsub.f32 %v325_v26, %v362_v10  ;;  %v2064_v14 = vsub.f32 %v326_v60, %v362_v10  ;;  %v931_v22 = vld [vmem:[%s2563_s4 + $0x80] sm:$0xff]  ;;  %v932_v23 = vld [vmem:[%s2563_s4 + $0x88] sm:$0xff] }
  0x49   :  { %v2066_v15 = vsub.f32 %v327_v33, %v362_v10  ;;  %v2072_v19 = vsub.f32 %v328_v43, %v362_v10  ;;  %v2087_v59 = vsub.f32 %v329_v49, %v362_v10  ;;  %v915_v26 = vld [vmem:[%s2563_s4] sm:$0xff]  ;;  %v916_v60 = vld [vmem:[%s2563_s4 + $0x8] sm:$0xff]  ;;  %v2112_v35 = vsub.f32 %v330_v53, %v362_v10 }
  0x4a   :  { %v373_v17 = vmul.f32 %v2058_v11, %v2058_v11  ;;  %v374_v18 = vmul.f32 %v2060_v12, %v2060_v12  ;;  %v375_v20 = vmul.f32 %v2062_v13, %v2062_v13  ;;  %v376_v21 = vmul.f32 %v2064_v14, %v2064_v14  ;;  %v948_v33 = vld [vmem:[%s2563_s4 + $0x108] sm:$0xff] }
  0x4b   :  { %v377_v27 = vmul.f32 %v2066_v15, %v2066_v15  ;;  %v2123_v40 = vsub.f32 %v331_v28, %v362_v10  ;;  %v378_v41 = vmul.f32 %v2072_v19, %v2072_v19  ;;  %v1493_v43 = vpack.c.bf16 %v932_v23, %v931_v22 }
  0x4c   :  { %v383_v16 = vsel %vm335_vm0, %v373_v17, 0.0  ;;  %v384_v29 = vsel %vm335_vm0, %v374_v18, 0.0  ;;  %v386_v31 = vsel %vm335_vm0, %v375_v20, 0.0  ;;  %v388_v42 = vsel %vm335_vm0, %v376_v21, 0.0  ;;  %v969_v20 = vld [vmem:[%s2563_s4 + $0x1b0] sm:$0xff]  ;;  %v970_v21 = vld [vmem:[%s2563_s4 + $0x1b8] sm:$0xff] }
  0x4d   :  { %v385_v36 = vadd.f32 %v384_v29, %v383_v16  ;;  %v1495_v49 = vpack.c.bf16 %v916_v60, %v915_v26  ;;  %v1527_v4 = vpack.c.bf16 %v948_v33, %v947_v32  ;;  %v379_v53 = vmul.f32 %v2087_v59, %v2087_v59  ;;  %1494 = vmatprep.subr.bf16.mxu0 %v1493_v43 }
  0x4e   :  { %v390_v54 = vsel %vm335_vm0, %v377_v27, 0.0  ;;  %v1529_v28 = vpack.c.bf16 %v966_v39, %v965_v38  ;;  %v372_v61 = vsub.f32 %v2052_v58, %v362_v10  ;;  %v380_v0 = vmul.f32 %v2112_v35, %v2112_v35  ;;  %v920_v58 = vld [vmem:[%s2563_s4 + $0x28] sm:$0xff]  ;;  %v938_v10 = vld [vmem:[%s2563_s4 + $0xb8] sm:$0xff] }
  0x4f   :  { %v387_v47 = vadd.f32 %v386_v31, %v385_v36  ;;  %1496 = vmatpush3.bf16.msra.mxu0 %v1495_v49  ;;  %v392_v1 = vsel %vm335_vm0, %v378_v41, 0.0  ;;  %1528 = vmatpush3.bf16.msra.mxu1 %v1527_v4  ;;  %v381_v17 = vmul.f32 %v2123_v40, %v2123_v40  ;;  %v394_v18 = vsel %vm335_vm0, %v379_v53, 0.0 }
  0x50   :  { %1498 = vmatprep.subr.bf16.mxu0 %v1497_v55  ;;  %1530 = vmatprep.subr.bf16.mxu1 %v1529_v28  ;;  %v1503_v23 = vpack.c.bf16 %v920_v58, %v919_v3  ;;  %v382_v24 = vmul.f32 %v372_v61, %v372_v61  ;;  %v396_v25 = vsel %vm335_vm0, %v380_v0, 0.0  ;;  %v1535_v26 = vpack.c.bf16 %v952_v8, %v951_v5 }
  0x51   :  { %v389_v62 = vadd.f32 %v388_v42, %v387_v47  ;;  %v1505_v60 = vpack.c.bf16 %v938_v10, %v937_v9  ;;  %v1537_v16 = vpack.c.bf16 %v970_v21, %v969_v20  ;;  %v398_v29 = vsel %vm335_vm0, %v381_v17, 0.0 }
  0x52   :  { %v400_v32 = vsel %vm335_vm0, %v382_v24, 0.0 }
  0x53   :  { %v391_v6 = vadd.f32 %v390_v54, %v389_v62  ;;  %1500 = vmatpush3.bf16.msra.mxu0 %v1499_v63  ;;  %1532 = vmatpush3.bf16.msra.mxu1 %v1531_v30 }
  0x54   :  { %1502 = vmatprep.subr.bf16.mxu0 %v1501_v2  ;;  %1534 = vmatprep.subr.bf16.mxu1 %v1533_v7 }
  0x55   :  { %v393_v22 = vadd.f32 %v392_v1, %v391_v6 }
  0x57   :  { %v395_v27 = vadd.f32 %v394_v18, %v393_v22  ;;  %1504 = vmatpush3.bf16.msra.mxu0 %v1503_v23  ;;  %1536 = vmatpush3.bf16.msra.mxu1 %v1535_v26 }
  0x58   :  { %1506 = vmatprep.subr.bf16.mxu0 %v1505_v60  ;;  %1538 = vmatprep.subr.bf16.mxu1 %v1537_v16 }
  0x59   :  { %v397_v31 = vadd.f32 %v396_v25, %v395_v27 }
  0x5b   :  { %v399_v33 = vadd.f32 %v398_v29, %v397_v31 }
  0x5d   :  { %v401_v34 = vadd.f32 %v400_v32, %v399_v33 }
  0x5f   :  { %v402_v36 = vrot.slane %v401_v34, 4 }
  0x61   :  { %v403_v37 = vadd.f32 %v402_v36, %v401_v34 }
  0x63   :  { %v404_v38 = vrot.slane %v403_v37, 2 }
  0x65   :  { %v405_v39 = vadd.f32 %v404_v38, %v403_v37 }
  0x67   :  { %v406_v41 = vrot.slane %v405_v39, 1 }
  0x69   :  { %v407_v42 = vadd.f32 %v406_v41, %v405_v39 }
  0x6b   :  { %v408_v43 = vmul.f32 0.0125, %v407_v42 }
  0x6d   :  { %v409_v44 = vadd.f32 1e-05, %v408_v43 }
  0x6f   :  { %1614 = vrsqrt.f32 %v409_v44 }
  0x79   :  { %v1615_v45 = vpop.eup %1614 }
  0x7a   :  { %v416_v47 = vmul.f32 %v1615_v45, %v2072_v19  ;;  %v417_v48 = vmul.f32 %v1615_v45, %v2087_v59  ;;  %v418_v49 = vmul.f32 %v1615_v45, %v2112_v35  ;;  %v419_v4 = vmul.f32 %v1615_v45, %v2123_v40 }
  0x7b   :  { %v420_v51 = vmul.f32 %v1615_v45, %v372_v61  ;;  %v411_v52 = vmul.f32 %v1615_v45, %v2058_v11  ;;  %v412_v53 = vmul.f32 %v1615_v45, %v2060_v12  ;;  %v413_v54 = vmul.f32 %v1615_v45, %v2062_v13 }
  0x7c   :  { %v432_v55 = vmul.f32 %v1388_v46, %v416_v47  ;;  %v433_v28 = vmul.f32 %v1388_v46, %v417_v48  ;;  %v434_v19 = vmul.f32 %v1388_v46, %v418_v49  ;;  %v435_v56 = vmul.f32 %v1388_v46, %v419_v4 }
  0x7d   :  { %v436_v59 = vmul.f32 %v1388_v46, %v420_v51  ;;  %v414_v35 = vmul.f32 %v1615_v45, %v2064_v14  ;;  %v415_v40 = vmul.f32 %v1615_v45, %v2066_v15  ;;  %v427_v57 = vmul.f32 %v1388_v46, %v411_v52 }
  0x7e   :  { %v448_v62 = vadd.f32 %v1389_v50, %v432_v55  ;;  %v449_v63 = vadd.f32 %v1389_v50, %v433_v28  ;;  %v450_v0 = vadd.f32 %v1389_v50, %v434_v19  ;;  %v451_v61 = vadd.f32 %v1389_v50, %v435_v56 }
  0x7f   :  { %v452_v1 = vadd.f32 %v1389_v50, %v436_v59  ;;  %v428_v11 = vmul.f32 %v1388_v46, %v412_v53  ;;  %v429_v30 = vmul.f32 %v1388_v46, %v413_v54  ;;  %v430_v12 = vmul.f32 %v1388_v46, %v414_v35 }
  0x80   :  { %v458_v2 = vadd.f32 3.0, %v448_v62  ;;  %v459_v13 = vadd.f32 3.0, %v449_v63  ;;  %v460_v3 = vadd.f32 3.0, %v450_v0  ;;  %v461_v58 = vadd.f32 3.0, %v451_v61 }
  0x81   :  { %v462_v5 = vadd.f32 3.0, %v452_v1  ;;  %v431_v6 = vmul.f32 %v1388_v46, %v415_v40  ;;  %v2204_v7 = vadd.f32 %v1389_v50, %v427_v57  ;;  %v2206_v14 = vadd.f32 %v1389_v50, %v428_v11 }
  0x82   :  { %v468_v15 = vmax.f32 %v458_v2, 0.0  ;;  %v469_v8 = vmax.f32 %v459_v13, 0.0  ;;  %v470_v9 = vmax.f32 %v460_v3, 0.0  ;;  %v471_v10 = vmax.f32 %v461_v58, 0.0 }
  0x83   :  { %v472_v17 = vmax.f32 %v462_v5, 0.0  ;;  %v2208_v18 = vadd.f32 %v1389_v50, %v429_v30  ;;  %v2210_v20 = vadd.f32 %v1389_v50, %v430_v12  ;;  %v2212_v21 = vadd.f32 %v1389_v50, %v431_v6 }
  0x84   :  { %v478_v22 = vmin.f32 %v468_v15, 6.0  ;;  %v479_v23 = vmin.f32 %v469_v8, 6.0  ;;  %v480_v24 = vmin.f32 %v470_v9, 6.0  ;;  %v481_v25 = vmin.f32 %v471_v10, 6.0 }
  0x85   :  { %v482_v26 = vmin.f32 %v472_v17, 6.0  ;;  %v453_v60 = vadd.f32 3.0, %v2204_v7  ;;  %v454_v27 = vadd.f32 3.0, %v2206_v14  ;;  %v455_v16 = vadd.f32 3.0, %v2208_v18 }
  0x86   :  { %v488_v29 = vmul.f32 %v478_v22, %v448_v62  ;;  %v489_v31 = vmul.f32 %v479_v23, %v449_v63  ;;  %v490_v32 = vmul.f32 %v480_v24, %v450_v0  ;;  %v491_v33 = vmul.f32 %v481_v25, %v451_v61 }
  0x87   :  { %v492_v34 = vmul.f32 %v482_v26, %v452_v1  ;;  %v456_v36 = vadd.f32 3.0, %v2210_v20  ;;  %v457_v37 = vadd.f32 3.0, %v2212_v21  ;;  %v463_v38 = vmax.f32 %v453_v60, 0.0 }
  0x88   :  { %v498_v39 = vmul.f32 0.16666667, %v488_v29  ;;  %v499_v41 = vmul.f32 0.16666667, %v489_v31  ;;  %v500_v42 = vmul.f32 0.16666667, %v490_v32 }
  0x89   :  { %v501_v43 = vmul.f32 0.16666667, %v491_v33  ;;  %v502_v44 = vmul.f32 0.16666667, %v492_v34  ;;  %v464_v45 = vmax.f32 %v454_v27, 0.0  ;;  %v465_v46 = vmax.f32 %v455_v16, 0.0 }
  0x8a   :  { %v523_v47 = vrot.slane %v498_v39, 7  ;;  %v524_v48 = vrot.slane %v499_v41, 7  ;;  %v526_v49 = vrot.slane %v500_v42, 7  ;;  %v466_v4 = vmax.f32 %v456_v36, 0.0 }
  0x8b   :  { %v528_v50 = vrot.slane %v501_v43, 7  ;;  %v530_v51 = vrot.slane %v502_v44, 7  ;;  %v467_v52 = vmax.f32 %v457_v37, 0.0  ;;  %v473_v53 = vmin.f32 %v463_v38, 6.0 }
  0x8c   :  { %v525_v54 = vsel %vm513_vm1, %v523_v47, %v524_v48  ;;  %v527_v55 = vsel %vm513_vm1, %v524_v48, %v526_v49  ;;  %v545_v28 = vsel %vm513_vm1, -inf, %v523_v47  ;;  %v474_v19 = vmin.f32 %v464_v45, 6.0 }
  0x8d   :  { %v529_v56 = vsel %vm513_vm1, %v526_v49, %v528_v50  ;;  %v531_v59 = vsel %vm513_vm1, %v528_v50, %v530_v51  ;;  %v547_v35 = vsel %vm513_vm1, %v530_v51, -inf  ;;  %v564_v40 = vrot.slane %v545_v28, 1 }
  0x8e   :  { %v565_v57 = vrot.slane %v525_v54, 1  ;;  %v567_v62 = vrot.slane %v527_v55, 1  ;;  %v569_v63 = vrot.slane %v529_v56, 1  ;;  %v571_v0 = vrot.slane %v531_v59, 1 }
  0x8f   :  { %v573_v61 = vrot.slane %v547_v35, 1  ;;  %v607_v1 = vrot.slane %v545_v28, 2  ;;  %v608_v11 = vrot.slane %v525_v54, 2  ;;  %v610_v30 = vrot.slane %v527_v55, 2 }
  0x90   :  { %v566_v12 = vsel %vm552_vm2, %v564_v40, %v565_v57  ;;  %v568_v2 = vsel %vm552_vm2, %v565_v57, %v567_v62  ;;  %v570_v13 = vsel %vm552_vm2, %v567_v62, %v569_v63  ;;  %v572_v3 = vsel %vm552_vm2, %v569_v63, %v571_v0 }
  0x91   :  { %v574_v58 = vsel %vm552_vm2, %v571_v0, %v573_v61  ;;  %v590_v5 = vmax.f32 %v545_v28, %v566_v12  ;;  %v591_v6 = vmax.f32 %v525_v54, %v568_v2  ;;  %v592_v15 = vmax.f32 %v527_v55, %v570_v13 }
  0x92   :  { %v593_v8 = vmax.f32 %v529_v56, %v572_v3  ;;  %v594_v9 = vmax.f32 %v531_v59, %v574_v58  ;;  %v609_v10 = vsel %vm595_vm3, %v607_v1, %v608_v11  ;;  %v611_v17 = vsel %vm595_vm3, %v608_v11, %v610_v30 }
  0x93   :  { %v612_v22 = vrot.slane %v529_v56, 2  ;;  %v614_v23 = vrot.slane %v531_v59, 2  ;;  %v616_v24 = vrot.slane %v547_v35, 2  ;;  %v633_v25 = vmax.f32 %v590_v5, %v609_v10 }
  0x94   :  { %v634_v26 = vmax.f32 %v591_v6, %v611_v17  ;;  %v475_v60 = vmin.f32 %v465_v46, 6.0  ;;  %v476_v27 = vmin.f32 %v466_v4, 6.0  ;;  %v477_v16 = vmin.f32 %v467_v52, 6.0 }
  0x95   :  { %v613_v29 = vsel %vm595_vm3, %v610_v30, %v612_v22  ;;  %v615_v31 = vsel %vm595_vm3, %v612_v22, %v614_v23  ;;  %v617_v32 = vsel %vm595_vm3, %v614_v23, %v616_v24  ;;  %v641_v33 = vrot.slane %v633_v25, 2 }
  0x96   :  { %v635_v34 = vmax.f32 %v592_v15, %v613_v29  ;;  %v636_v36 = vmax.f32 %v593_v8, %v615_v31  ;;  %v637_v37 = vmax.f32 %v594_v9, %v617_v32  ;;  %v645_v38 = vrot.slane %v633_v25, 4 }
  0x97   :  { %v651_v39 = vrot.slane %v634_v26, 6  ;;  %v655_v41 = vrot.slane %v634_v26, 2  ;;  %v689_v42 = vsel %vm513_vm1, %v633_v25, %v641_v33  ;;  %v483_v43 = vmul.f32 %v473_v53, %v2204_v7 }
  0x98   :  { %v661_v44 = vrot.slane %v635_v34, 4  ;;  %v665_v45 = vrot.slane %v635_v34, 6  ;;  %v671_v46 = vrot.slane %v636_v36, 2  ;;  %v675_v47 = vrot.slane %v636_v36, 4 }
  0x99   :  { %v681_v48 = vrot.slane %v637_v37, 6  ;;  %v685_v49 = vrot.slane %v637_v37, 2  ;;  %v692_v4 = vsel %vm690_vm4, %v689_v42, %v645_v38  ;;  %v484_v50 = vmul.f32 %v474_v19, %v2206_v14 }
  0x9a   :  { %v695_v51 = vsel %vm693_vm5, %v692_v4, %v651_v39  ;;  %v707_v52 = vsel %vm513_vm1, %v636_v36, %v671_v46  ;;  %v485_v54 = vmul.f32 %v475_v60, %v2208_v18  ;;  %v486_v55 = vmul.f32 %v476_v27, %v2210_v20  ;;  %v921_v20 = vld [vmem:[%s2563_s4 + $0x30] sm:$0xff] }
  0x9b   :  { %v698_v7 = vsel %vm696_vm6, %v695_v51, %v634_v26  ;;  %v709_v53 = vsel %vm690_vm4, %v707_v52, %v675_v47  ;;  %v487_v28 = vmul.f32 %v477_v16, %v2212_v21  ;;  %v493_v56 = vmul.f32 0.16666667, %v483_v43  ;;  %v922_v21 = vld [vmem:[%s2563_s4 + $0x38] sm:$0xff] }
  0x9c   :  { %v701_v59 = vsel %vm699_vm7, %v698_v7, %v655_v41  ;;  %v711_v35 = vsel %vm693_vm5, %v709_v53, %v681_v48  ;;  %v494_v14 = vmul.f32 0.16666667, %v484_v50  ;;  %v495_v19 = vmul.f32 0.16666667, %v485_v54 }
  0x9d   :  { %v703_v40 = vsel %vm595_vm3, %v701_v59, %v661_v44  ;;  %v713_v57 = vsel %vm696_vm6, %v711_v35, %v637_v37  ;;  %v496_v18 = vmul.f32 0.16666667, %v486_v55  ;;  %v497_v62 = vmul.f32 0.16666667, %v487_v28 }
  0x9e   :  { %v705_v63 = vsel %vm552_vm2, %v703_v40, %v665_v45  ;;  %v715_v0 = vsel %vm699_vm7, %v713_v57, %v685_v49  ;;  %v514_v61 = vrot.slane %v493_v56, 7  ;;  %v515_v1 = vrot.slane %v494_v14, 7 }
  0x9f   :  { %v723_v11 = vrot.slane %v705_v63, 6  ;;  %v724_v30 = vrot.slane %v715_v0, 6  ;;  %v517_v12 = vrot.slane %v495_v19, 7  ;;  %v519_v2 = vrot.slane %v496_v18, 7 }
  0xa0   :  { %v516_v13 = vsel %vm513_vm1, %v514_v61, %v515_v1  ;;  %v521_v3 = vrot.slane %v497_v62, 7  ;;  %v544_v58 = vsel %vm513_vm1, -inf, %v514_v61  ;;  %v1507_v5 = vpack.c.bf16 %v922_v21, %v921_v20 }
  0xa1   :  { %v2261_v6 = vsel %vm690_vm4, %v723_v11, %v724_v30  ;;  %v2264_v15 = vsel %vm690_vm4, 0.0, %v723_v11  ;;  %v518_v8 = vsel %vm513_vm1, %v515_v1, %v517_v12  ;;  %v520_v9 = vsel %vm513_vm1, %v517_v12, %v519_v2  ;;  %v953_v30 = vld [vmem:[%s2563_s4 + $0x130] sm:$0xff]  ;;  %v954_v12 = vld [vmem:[%s2563_s4 + $0x138] sm:$0xff] }
  0xa2   :  { %v738_v10 = vrot.slane %v2261_v6, 1  ;;  %v794_v17 = vrot.slane %v2261_v6, 5  ;;  %v765_v22 = vrot.slane %v2264_v15, 3  ;;  %v766_v23 = vrot.slane %v2261_v6, 3  ;;  %1508 = vmatpush3.bf16.msra.mxu0 %v1507_v5 }
  0xa3   :  { %v827_v24 = vrot.slane %v2264_v15, 7  ;;  %v828_v25 = vrot.slane %v2261_v6, 7  ;;  %v522_v26 = vsel %vm513_vm1, %v519_v2, %v521_v3  ;;  %v546_v60 = vsel %vm513_vm1, %v521_v3, -inf }
  0xa4   :  { %v1574_v27 = vpack.i.bf16 %v794_v17, %v738_v10  ;;  %v767_v16 = vsel %vm699_vm7, %v765_v22, %v766_v23  ;;  %v553_v29 = vrot.slane %v544_v58, 1  ;;  %v554_v31 = vrot.slane %v516_v13, 1  ;;  %v939_v22 = vld [vmem:[%s2563_s4 + $0xc0] sm:$0xff] }
  0xa5   :  { %v829_v32 = vsel %vm513_vm1, %v827_v24, %v828_v25  ;;  %v556_v33 = vrot.slane %v518_v8, 1  ;;  %v558_v34 = vrot.slane %v520_v9, 1  ;;  %v560_v36 = vrot.slane %v522_v26, 1  ;;  %v940_v24 = vld [vmem:[%s2563_s4 + $0xc8] sm:$0xff] }
  0xa6   :  { %1575 = vrot.lane.b32.xlu1 %v1574_v27, %s1642_s30  ;;  %v1579_v37 = vpack.i.bf16 %v829_v32, %v767_v16  ;;  %v555_v38 = vsel %vm552_vm2, %v553_v29, %v554_v31  ;;  %v562_v39 = vrot.slane %v546_v60, 1  ;;  %v596_v41 = vrot.slane %v544_v58, 2  ;;  %v972_v29 = vld [vmem:[%s2563_s4 + $0x1c8] sm:$0xff] }
  0xa7   :  { %v557_v42 = vsel %vm552_vm2, %v554_v31, %v556_v33  ;;  %v559_v43 = vsel %vm552_vm2, %v556_v33, %v558_v34  ;;  %v561_v44 = vsel %vm552_vm2, %v558_v34, %v560_v36  ;;  %v585_v45 = vmax.f32 %v544_v58, %v555_v38  ;;  %v923_v31 = vld [vmem:[%s2563_s4 + $0x40] sm:$0xff]  ;;  %v924_v32 = vld [vmem:[%s2563_s4 + $0x48] sm:$0xff]  ;;  %v941_v38 = vld [vmem:[%s2563_s4 + $0xd0] sm:$0xff] }
  0xa8   :  { %1580 = vrot.lane.b32.xlu0 %v1579_v37, %s1642_s30  ;;  %v563_v46 = vsel %vm552_vm2, %v560_v36, %v562_v39  ;;  %v586_v47 = vmax.f32 %v516_v13, %v557_v42  ;;  %v587_v48 = vmax.f32 %v518_v8, %v559_v43  ;;  %v588_v49 = vmax.f32 %v520_v9, %v561_v44  ;;  %v955_v36 = vld [vmem:[%s2563_s4 + $0x140] sm:$0xff]  ;;  %v956_v37 = vld [vmem:[%s2563_s4 + $0x148] sm:$0xff] }
  0xa9   :  { %v589_v4 = vmax.f32 %v522_v26, %v563_v46  ;;  %v597_v50 = vrot.slane %v516_v13, 2  ;;  %v599_v51 = vrot.slane %v518_v8, 2  ;;  %v601_v52 = vrot.slane %v520_v9, 2  ;;  %v973_v46 = vld [vmem:[%s2563_s4 + $0x1d0] sm:$0xff] }
  0xaa   :  { %v603_v54 = vrot.slane %v522_v26, 2  ;;  %v605_v55 = vrot.slane %v546_v60, 2  ;;  %v737_v7 = vrot.slane %v2264_v15, 1  ;;  %v793_v59 = vrot.slane %v2264_v15, 5  ;;  %v971_v26 = vld [vmem:[%s2563_s4 + $0x1c0] sm:$0xff] }
  0xab   :  { %v598_v53 = vsel %vm595_vm3, %v596_v41, %v597_v50  ;;  %v600_v28 = vsel %vm595_vm3, %v597_v50, %v599_v51  ;;  %v602_v56 = vsel %vm595_vm3, %v599_v51, %v601_v52  ;;  %v1539_v16 = vpack.c.bf16 %v954_v12, %v953_v30  ;;  %v925_v50 = vld [vmem:[%s2563_s4 + $0x50] sm:$0xff]  ;;  %v926_v51 = vld [vmem:[%s2563_s4 + $0x58] sm:$0xff] }
  0xac   :  { %v604_v35 = vsel %vm595_vm3, %v601_v52, %v603_v54  ;;  %v606_v14 = vsel %vm595_vm3, %v603_v54, %v605_v55  ;;  %v628_v19 = vmax.f32 %v585_v45, %v598_v53  ;;  %v629_v40 = vmax.f32 %v586_v47, %v600_v28  ;;  %v942_v45 = vld [vmem:[%s2563_s4 + $0xd8] sm:$0xff]  ;;  %v957_v52 = vld [vmem:[%s2563_s4 + $0x150] sm:$0xff]  ;;  %v943_v28 = vld [vmem:[%s2563_s4 + $0xe0] sm:$0xff] }
  0xad   :  { %v630_v57 = vmax.f32 %v587_v48, %v602_v56  ;;  %v631_v18 = vmax.f32 %v588_v49, %v604_v35  ;;  %v632_v62 = vmax.f32 %v589_v4, %v606_v14  ;;  %v739_v0 = vsel %vm552_vm2, %v737_v7, %v738_v10  ;;  %1540 = vmatpush3.bf16.msra.mxu1 %v1539_v16  ;;  %v974_v47 = vld [vmem:[%s2563_s4 + $0x1d8] sm:$0xff]  ;;  %v944_v56 = vld [vmem:[%s2563_s4 + $0xe8] sm:$0xff] }
  0xae   :  { %v640_v20 = vrot.slane %v628_v19, 2  ;;  %v644_v21 = vrot.slane %v628_v19, 4  ;;  %v650_v63 = vrot.slane %v629_v40, 6  ;;  %v654_v61 = vrot.slane %v629_v40, 2  ;;  %v958_v53 = vld [vmem:[%s2563_s4 + $0x158] sm:$0xff] }
  0xaf   :  { %v670_v1 = vrot.slane %v631_v18, 2  ;;  %v674_v11 = vrot.slane %v631_v18, 4  ;;  %v660_v2 = vrot.slane %v630_v57, 4  ;;  %v680_v13 = vrot.slane %v632_v62, 6  ;;  %v946_v16 = vld [vmem:[%s2563_s4 + $0xf8] sm:$0xff] }
  0xb0   :  { %v688_v3 = vsel %vm513_vm1, %v628_v19, %v640_v20  ;;  %v795_v58 = vsel %vm693_vm5, %v793_v59, %v794_v17  ;;  %v684_v5 = vrot.slane %v632_v62, 2  ;;  %v664_v60 = vrot.slane %v630_v57, 6 }
  0xb1   :  { %v691_v8 = vsel %vm690_vm4, %v688_v3, %v644_v21  ;;  %v706_v9 = vsel %vm513_vm1, %v631_v18, %v670_v1  ;;  %v1584_v10 = vpack.i.bf16 %v795_v58, %v739_v0  ;;  %v1643_v42 = vmov 0.0   ;;  %v976_v58 = vld [vmem:[%s2563_s4 + $0x1e8] sm:$0xff] }
  0xb2   :  { %v694_v17 = vsel %vm693_vm5, %v691_v8, %v650_v63  ;;  %v708_v27 = vsel %vm690_vm4, %v706_v9, %v674_v11  ;;  %v825_v43 = vrot.slane %v1643_v42, 7  ;;  %v1509_v44 = vpack.c.bf16 %v940_v24, %v939_v22  ;;  %v928_v8 = vld [vmem:[%s2563_s4 + $0x68] sm:$0xff] }
  0xb3   :  { %v697_v33 = vsel %vm696_vm6, %v694_v17, %v629_v40  ;;  %v710_v34 = vsel %vm693_vm5, %v708_v27, %v680_v13  ;;  %1585 = vrot.lane.b32.xlu0 %v1584_v10, %s1642_s30  ;;  %v1541_v4 = vpack.c.bf16 %v972_v29, %v971_v26  ;;  %v1511_v7 = vpack.c.bf16 %v924_v32, %v923_v31  ;;  %v959_v26 = vld [vmem:[%s2563_s4 + $0x160] sm:$0xff]  ;;  %v945_v17 = vld [vmem:[%s2563_s4 + $0xf0] sm:$0xff]  ;;  %v978_v31 = vld [vmem:[%s2563_s4 + $0x1f8] sm:$0xff] }
  0xb4   :  { %v700_v39 = vsel %vm699_vm7, %v697_v33, %v654_v61  ;;  %v712_v41 = vsel %vm696_vm6, %v710_v34, %v632_v62  ;;  %1510 = vmatprep.subr.bf16.mxu0 %v1509_v44  ;;  %v1543_v35 = vpack.c.bf16 %v956_v37, %v955_v36  ;;  %v1513_v14 = vpack.c.bf16 %v942_v45, %v941_v38  ;;  %v977_v29 = vld [vmem:[%s2563_s4 + $0x1f0] sm:$0xff]  ;;  %v930_v34 = vld [vmem:[%s2563_s4 + $0x78] sm:$0xff] }
  0xb5   :  { %v702_v48 = vsel %vm595_vm3, %v700_v39, %v660_v2  ;;  %v714_v49 = vsel %vm699_vm7, %v712_v41, %v684_v5  ;;  %1542 = vmatprep.subr.bf16.mxu1 %v1541_v4  ;;  %v830_v19 = vsel %vm513_vm1, %v828_v25, %v825_v43  ;;  %1512 = vmatpush3.bf16.msra.mxu0 %v1511_v7  ;;  %v975_v2 = vld [vmem:[%s2563_s4 + $0x1e0] sm:$0xff]  ;;  %v929_v33 = vld [vmem:[%s2563_s4 + $0x70] sm:$0xff]  ;;  %v784_v4 = vrot.slane %v2261_v6, 4 }
  0xb6   :  { %v704_v54 = vsel %vm552_vm2, %v702_v48, %v664_v60  ;;  %v721_v55 = vrot.slane %v714_v49, 6  ;;  %v1545_v40 = vpack.c.bf16 %v974_v47, %v973_v46  ;;  %v1515_v57 = vpack.c.bf16 %v926_v51, %v925_v50  ;;  %1544 = vmatpush3.bf16.msra.mxu1 %v1543_v35  ;;  %1514 = vmatprep.subr.bf16.mxu0 %v1513_v14  ;;  %v927_v5 = vld [vmem:[%s2563_s4 + $0x60] sm:$0xff]  ;;  %v960_v60 = vld [vmem:[%s2563_s4 + $0x168] sm:$0xff]  ;;  %v961_v41 = vld [vmem:[%s2563_s4 + $0x170] sm:$0xff] }
  0xb7   :  { %v720_v59 = vrot.slane %v704_v54, 6  ;;  %v1547_v20 = vpack.c.bf16 %v958_v53, %v957_v52  ;;  %v1517_v21 = vpack.c.bf16 %v944_v56, %v943_v28  ;;  %v1549_v37 = vpack.c.bf16 %v976_v58, %v975_v2 }
  0xb8   :  { %1546 = vmatprep.subr.bf16.mxu1 %v1545_v40  ;;  %v1519_v38 = vpack.c.bf16 %v928_v8, %v927_v5  ;;  %v1551_v39 = vpack.c.bf16 %v960_v60, %v959_v26  ;;  %v1553_v44 = vpack.c.bf16 %v978_v31, %v977_v29  ;;  %v1523_v45 = vpack.c.bf16 %v930_v34, %v929_v33 }
  0xb9   :  { %v2376_v18 = vsel %vm690_vm4, %v720_v59, %v721_v55  ;;  %v2379_v62 = vsel %vm690_vm4, 0.0, %v720_v59  ;;  %1516 = vmatpush3.bf16.msra.mxu0 %v1515_v57  ;;  %v783_v49 = vrot.slane %v2264_v15, 4  ;;  %v755_v50 = vrot.slane %v2264_v15, 2 }
  0xba   :  { %v762_v63 = vrot.slane %v2379_v62, 3  ;;  %v763_v0 = vrot.slane %v2376_v18, 3  ;;  %v822_v61 = vrot.slane %v2379_v62, 7  ;;  %v823_v25 = vrot.slane %v2376_v18, 7  ;;  %1548 = vmatpush3.bf16.msra.mxu1 %v1547_v20  ;;  %1518 = vmatprep.subr.bf16.mxu0 %v1517_v21 }
  0xbb   :  { %v734_v1 = vrot.slane %v2379_v62, 1  ;;  %v735_v11 = vrot.slane %v2376_v18, 1  ;;  %v790_v30 = vrot.slane %v2379_v62, 5  ;;  %v791_v12 = vrot.slane %v2376_v18, 5  ;;  %1550 = vmatprep.subr.bf16.mxu1 %v1549_v37 }
  0xbc   :  { %v764_v13 = vsel %vm699_vm7, %v762_v63, %v763_v0  ;;  %v824_v3 = vsel %vm513_vm1, %v822_v61, %v823_v25  ;;  %v826_v24 = vsel %vm513_vm1, %v823_v25, %v825_v43  ;;  %v1521_v43 = vpack.c.bf16 %v946_v16, %v945_v17 }
  0xbd   :  { %v1589_v9 = vpack.i.bf16 %v824_v3, %v764_v13  ;;  %v736_v10 = vsel %vm552_vm2, %v734_v1, %v735_v11  ;;  %v792_v22 = vsel %vm693_vm5, %v790_v30, %v791_v12  ;;  %v1604_v36 = vpack.i.bf16 %v826_v24, %v763_v0  ;;  %1520 = vmatpush3.bf16.msra.mxu0 %v1519_v38 }
  0xbe   :  { %v1599_v27 = vpack.i.bf16 %v830_v19, %v792_v22  ;;  %v1594_v32 = vpack.i.bf16 %v766_v23, %v736_v10  ;;  %v962_v23 = vld [vmem:[%s2563_s4 + $0x178] sm:$0xff]  ;;  %v1609_v46 = vpack.i.bf16 %v791_v12, %v735_v11  ;;  %1552 = vmatpush3.bf16.msra.mxu1 %v1551_v39  ;;  %1522 = vmatprep.subr.bf16.mxu0 %v1521_v43  ;;  %v814_v51 = vrot.slane %v2264_v15, 6 }
  0xbf   :  { %1590 = vrot.lane.b32.xlu1 %v1589_v9, %s1642_s30  ;;  %v1555_v47 = vpack.c.bf16 %v962_v23, %v961_v41  ;;  %1554 = vmatprep.subr.bf16.mxu1 %v1553_v44  ;;  %v815_v52 = vrot.slane %v2261_v6, 6  ;;  %v756_v54 = vrot.slane %v2261_v6, 2  ;;  %v785_v28 = vsel %vm696_vm6, %v783_v49, %v784_v4 }
  0xc0   :  { %1600 = vrot.lane.b32.xlu0 %v1599_v27, %s1642_s30  ;;  %v752_v20 = vrot.slane %v2379_v62, 2  ;;  %v809_v21 = vrot.slane %v2379_v62, 6  ;;  %v812_v63 = vrot.slane %v1643_v42, 6  ;;  %v810_v25 = vrot.slane %v2376_v18, 6 }
  0xc1   :  { %1524 = vmatpush3.bf16.msra.mxu0 %v1523_v45  ;;  %v816_v35 = vsel %vm690_vm4, %v814_v51, %v815_v52  ;;  %v757_v14 = vsel %vm595_vm3, %v755_v50, %v756_v54  ;;  %v753_v1 = vrot.slane %v2376_v18, 2  ;;  %v780_v12 = vrot.slane %v2379_v62, 4 }
  0xc2   :  { %1556 = vmatpush3.bf16.msra.mxu1 %v1555_v47  ;;  %v811_v5 = vsel %vm690_vm4, %v809_v21, %v810_v25  ;;  %v817_v9 = vsel %vm690_vm4, %v815_v52, %v812_v63  ;;  %v813_v60 = vsel %vm690_vm4, %v810_v25, %v812_v63 }
  0xc3   :  { %1595 = vrot.lane.b32.xlu1 %v1594_v32, %s1642_s30  ;;  %v754_v8 = vsel %vm595_vm3, %v752_v20, %v753_v1 }
  0xc4   :  { %1605 = vrot.lane.b32.xlu0 %v1604_v36, %s1642_s30 }
  0xc7   :  { %1610 = vrot.lane.b32.xlu1 %v1609_v46, %s1642_s30 }
 0x118   :  { %v1576_v57 = vpop.permute.xlu1 %1575 }
 0x119   :  { %v1578_v2 = vunpack.i.h.bf16 %v1576_v57  ;;  %v1577_v13 = vunpack.i.l.bf16 %v1576_v57 }
 0x11a   :  { %v1581_v48 = vpop.permute.xlu0 %1580 }
 0x11b   :  { %v1583_v56 = vunpack.i.h.bf16 %v1581_v48  ;;  %v1582_v59 = vunpack.i.l.bf16 %v1581_v48  ;;  %v854_v17 = vsel %vm335_vm0, %v784_v4, %v1578_v2  ;;  %v846_v27 = vsel %vm335_vm0, %v2261_v6, %v1577_v13 }
 0x11d   :  { %v857_v0 = vsel %vm335_vm0, %v816_v35, %v1583_v56  ;;  %v849_v61 = vsel %vm335_vm0, %v757_v14, %v1582_v59 }
 0x11e   :  { %v874_v3 = vrot.slane %v857_v0, 4  ;;  %v872_v58 = vrot.slane %v849_v61, 4 }
 0x120   :  { %v888_v34 = vsel %vm513_vm1, %v849_v61, %v872_v58  ;;  %v890_v36 = vsel %vm513_vm1, %v857_v0, %v874_v3 }
 0x125   :  { %v1586_v55 = vpop.permute.xlu0 %1585 }
 0x126   :  { %v1588_v7 = vunpack.i.h.bf16 %v1586_v55  ;;  %v1587_v53 = vunpack.i.l.bf16 %v1586_v55 }
 0x128   :  { %v853_v19 = vsel %vm335_vm0, %v785_v28, %v1588_v7  ;;  %v845_v40 = vsel %vm335_vm0, %v2264_v15, %v1587_v53  ;;  %v781_v15 = vrot.slane %v2376_v18, 4 }
 0x129   :  { %v873_v11 = vrot.slane %v853_v19, 4  ;;  %v871_v30 = vrot.slane %v845_v40, 4 }
 0x12a   :  { %v782_v26 = vsel %vm696_vm6, %v780_v12, %v781_v15 }
 0x12b   :  { %v889_v22 = vsel %vm513_vm1, %v853_v19, %v873_v11  ;;  %v887_v24 = vsel %vm513_vm1, %v845_v40, %v871_v30 }
 0x12c   :  { %v895_v39 = vsel %vm690_vm4, %v887_v24, %v846_v27  ;;  %v897_v41 = vsel %vm690_vm4, %v889_v22, %v854_v17  ;;  %v1199_v22 = vld [vmem:[%s2566_s7 + $0x20] sm:$0xff]  ;;  %v1200_v24 = vld [vmem:[%s2566_s7 + $0x28] sm:$0xff]  ;;  %v1202_v17 = vld [vmem:[%s2566_s7 + $0x38] sm:$0xff] }
 0x12d   :  { %v903_v0 = vrot.slane %v895_v39, 5  ;;  %v905_v61 = vrot.slane %v897_v41, 5 }
 0x131   :  { %v1591_v10 = vpop.permute.xlu1 %1590 }
 0x132   :  { %v1593_v16 = vunpack.i.h.bf16 %v1591_v10  ;;  %v1592_v29 = vunpack.i.l.bf16 %v1591_v10  ;;  %v1601_v31 = vpop.permute.xlu0 %1600 }
 0x133   :  { %v1603_v32 = vunpack.i.h.bf16 %v1601_v31  ;;  %v1602_v33 = vunpack.i.l.bf16 %v1601_v31 }
 0x134   :  { %v855_v37 = vsel %vm335_vm0, %v811_v5, %v1593_v16  ;;  %v847_v38 = vsel %vm335_vm0, %v754_v8, %v1592_v29  ;;  %v1644_v5 = vmov 0.0|0.0   ;;  %v1197_v8 = vld [vmem:[%s2566_s7 + $0x10] sm:$0xff] }
 0x135   :  { %v870_v23 = vrot.slane %v855_v37, 4  ;;  %v868_v43 = vrot.slane %v847_v38, 4  ;;  %v1596_v44 = vpop.permute.xlu1 %1595  ;;  %v858_v45 = vsel %vm335_vm0, %v817_v9, %v1603_v32  ;;  %v851_v46 = vsel %vm335_vm0, %v782_v26, %v1602_v33  ;;  %1557 = vmatprep.subr.bf16.mxu0 %v1644_v5  ;;  %v1198_v9 = vld [vmem:[%s2566_s7 + $0x18] sm:$0xff] }
 0x136   :  { %v1598_v47 = vunpack.i.h.bf16 %v1596_v44  ;;  %v1597_v48 = vunpack.i.l.bf16 %v1596_v44  ;;  %v869_v49 = vrot.slane %v851_v46, 4  ;;  %v1606_v4 = vpop.permute.xlu0 %1605  ;;  %v898_v50 = vsel %vm690_vm4, %v890_v36, %v858_v45 }
 0x137   :  { %v1608_v51 = vunpack.i.h.bf16 %v1606_v4  ;;  %v1607_v52 = vunpack.i.l.bf16 %v1606_v4  ;;  %v884_v55 = vsel %vm513_vm1, %v847_v38, %v868_v43  ;;  %v886_v7 = vsel %vm513_vm1, %v855_v37, %v870_v23 }
 0x138   :  { %v850_v53 = vsel %vm335_vm0, %v756_v54, %v1598_v47  ;;  %v843_v28 = vsel %vm335_vm0, %v2379_v62, %v1597_v48  ;;  %v906_v56 = vrot.slane %v898_v50, 5  ;;  %v885_v59 = vsel %vm513_vm1, %v851_v46, %v869_v49 }
 0x139   :  { %v867_v35 = vrot.slane %v843_v28, 4  ;;  %v1611_v14 = vpop.permute.xlu1 %1610  ;;  %v848_v19 = vsel %vm335_vm0, %v753_v1, %v1607_v52  ;;  %v896_v40 = vsel %vm690_vm4, %v888_v34, %v850_v53  ;;  %v856_v57 = vsel %vm335_vm0, %v813_v60, %v1608_v51  ;;  %v1201_v60 = vld [vmem:[%s2566_s7 + $0x30] sm:$0xff] }
 0x13a   :  { %v1613_v20 = vunpack.i.h.bf16 %v1611_v14  ;;  %v1612_v21 = vunpack.i.l.bf16 %v1611_v14  ;;  %v892_v6 = vsel %vm690_vm4, %v884_v55, %v848_v19  ;;  %v904_v63 = vrot.slane %v896_v40, 5 }
 0x13b   :  { %v894_v54 = vsel %vm690_vm4, %v886_v7, %v856_v57  ;;  %v883_v62 = vsel %vm513_vm1, %v843_v28, %v867_v35  ;;  %v1561_v10 = vpack.c.bf16 %v1198_v9, %v1197_v8  ;;  %v1564_v26 = vpack.c.bf16 %v1200_v24, %v1199_v22  ;;  %v1390_v28 = vld [vmem:[%s2564_s5] ss:$0 sm:$0xff] }
 0x13c   :  { %v852_v25 = vsel %vm335_vm0, %v781_v15, %v1613_v20  ;;  %v844_v1 = vsel %vm335_vm0, %v2376_v18, %v1612_v21  ;;  %v912_v11 = vsel %vm693_vm5, %v892_v6, %v904_v63  ;;  %v914_v30 = vsel %vm693_vm5, %v894_v54, %v906_v56  ;;  %v1195_v18 = vld [vmem:[%s2566_s7] sm:$0xff]  ;;  %v1196_v15 = vld [vmem:[%s2566_s7 + $0x8] sm:$0xff] }
 0x13d   :  { %1043 = vmatprep.mubr.f32.mxu0 %v912_v11  ;;  %1113 = vmatprep.mubr.f32.mxu1 %v914_v30  ;;  %v891_v12 = vsel %vm690_vm4, %v883_v62, %v844_v1  ;;  %v893_v2 = vsel %vm690_vm4, %v885_v59, %v852_v25  ;;  %v1558_v58 = vpack.c.bf16 %v1196_v15, %v1195_v18  ;;  %v1391_v59 = vld [vmem:[%s2565_s6] ss:$0 sm:$0xff] }
 0x13e   :  { %v911_v13 = vsel %vm693_vm5, %v891_v12, %v903_v0  ;;  %v913_v3 = vsel %vm693_vm5, %v893_v2, %v905_v61  ;;  %v1567_v27 = vpack.c.bf16 %v1202_v17, %v1201_v60 }
 0x13f   :  { %1044 = vmatmul.mubr.f32.vlgmr.msra.gmra.mrb[0].mxu0 %v911_v13  ;;  %1114 = vmatmul.mubr.f32.vlgmr.msra.gmra.mrb[0].mxu1 %v913_v3 }
 0x140   :  { %1559 = vmatpush3.bf16.msra.mxu0 %v1558_v58  ;;  %1490 = vmatprep.mubr.msk.f32.mxu0 %vm1645_vm8, %v1643_v42 }
 0x141   :  { %1560 = vmatprep.subr.bf16.mxu0 %v1644_v5 }
 0x144   :  { %1562 = vmatpush3.bf16.msra.mxu0 %v1561_v10  ;;  %v1393_v10 = vld [vmem:[%s2567_s8] ss:$0 sm:$0xff] }
 0x145   :  { %1563 = vmatprep.subr.bf16.mxu0 %v1644_v5 }
 0x148   :  { %1565 = vmatpush3.bf16.msra.mxu0 %v1564_v26 }
 0x149   :  { %1566 = vmatprep.subr.bf16.mxu0 %v1644_v5 }
 0x14c   :  { %1568 = vmatpush3.bf16.msra.mxu0 %v1567_v27 }
 0x212   :  { %v1427_v16 = vpop.f32.mrb[0].mxu0  ;;  %v1462_v29 = vpop.f32.mrb[0].mxu1 }
 0x213   :  { %v1428_v31 = vpop.f32.mrb[1].mxu0  ;;  %v1463_v32 = vpop.f32.mrb[1].mxu1 }
 0x214   :  { %v1429_v42 = vadd.f32 %v1428_v31, %v1427_v16  ;;  %v1464_v33 = vadd.f32 %v1463_v32, %v1462_v29 }
 0x216   :  { %v1116_v34 = vadd.f32 %v1464_v33, %v1429_v42 }
 0x218   :  { %v1122_v36 = vsel %vm1121_vm9, %v1116_v34, 0.0 }
 0x219   :  { %v1123_v37 = vrot.slane %v1122_v36, 4 }
 0x21b   :  { %v1124_v38 = vadd.f32 %v1123_v37, %v1122_v36 }
 0x21d   :  { %v1125_v39 = vrot.slane %v1124_v38, 2 }
 0x21f   :  { %v1126_v41 = vadd.f32 %v1125_v39, %v1124_v38 }
 0x221   :  { %v1127_v23 = vrot.slane %v1126_v41, 1 }
 0x223   :  { %v1128_v43 = vadd.f32 %v1127_v23, %v1126_v41 }
 0x225   :  { %v1130_v44 = vmul.f32 0.16666667, %v1128_v43 }
 0x227   :  { %v1131_v45 = vsub.f32 %v1116_v34, %v1130_v44 }
 0x229   :  { %v1132_v46 = vmul.f32 %v1131_v45, %v1131_v45 }
 0x22b   :  { %v1133_v47 = vsel %vm1121_vm9, %v1132_v46, 0.0 }
 0x22c   :  { %v1134_v48 = vrot.slane %v1133_v47, 4 }
 0x22e   :  { %v1135_v49 = vadd.f32 %v1134_v48, %v1133_v47 }
 0x230   :  { %v1136_v4 = vrot.slane %v1135_v49, 2 }
 0x232   :  { %v1137_v50 = vadd.f32 %v1136_v4, %v1135_v49 }
 0x234   :  { %v1138_v51 = vrot.slane %v1137_v50, 1 }
 0x236   :  { %v1139_v52 = vadd.f32 %v1138_v51, %v1137_v50 }
 0x238   :  { %v1140_v55 = vmul.f32 0.16666667, %v1139_v52 }
 0x23a   :  { %v1141_v7 = vadd.f32 1e-05, %v1140_v55 }
 0x23c   :  { %1616 = vrsqrt.f32 %v1141_v7 }
 0x246   :  { %v1617_v53 = vpop.eup %1616 }
 0x247   :  { %v1143_v56 = vmul.f32 %v1617_v53, %v1131_v45 }
 0x249   :  { %v1150_v35 = vmul.f32 %v1390_v28, %v1143_v56 }
 0x24b   :  { %v1157_v14 = vadd.f32 %v1391_v59, %v1150_v35 }
 0x24d   :  { %v1158_v19 = vadd.f32 3.0, %v1157_v14 }
 0x24f   :  { %v1159_v40 = vmax.f32 %v1158_v19, 0.0 }
 0x251   :  { %v1160_v57 = vmin.f32 %v1159_v40, 6.0 }
 0x253   :  { %v1161_v20 = vmul.f32 %v1160_v57, %v1157_v14 }
 0x255   :  { %v1162_v21 = vmul.f32 0.16666667, %v1161_v20 }
 0x257   :  { %v1165_v6 = vrot.slane %v1162_v21, 7  ;;  %v1392_v63 = vrot.slane %v1162_v21, 10 }
 0x259   :  { %v1169_v54 = vsel %vm513_vm1, -inf, %v1165_v6  ;;  %v1170_v62 = vsel %vm513_vm1, -inf, %v1392_v63 }
 0x25a   :  { %v1171_v0 = vsel %vm696_vm6, %v1169_v54, -inf  ;;  %v1172_v61 = vsel %vm696_vm6, %v1170_v62, -inf }
 0x25b   :  { %v1175_v25 = vrot.slane %v1171_v0, 1  ;;  %v1176_v1 = vrot.slane %v1172_v61, 1  ;;  %v1181_v12 = vrot.slane %v1171_v0, 2  ;;  %v1182_v2 = vrot.slane %v1172_v61, 2 }
 0x25c   :  { %v1188_v18 = vrot.slane %v1172_v61, 3  ;;  %v1187_v15 = vrot.slane %v1171_v0, 3 }
 0x25d   :  { %v1179_v11 = vmax.f32 %v1171_v0, %v1175_v25  ;;  %v1180_v30 = vmax.f32 %v1172_v61, %v1176_v1 }
 0x25f   :  { %v1185_v13 = vmax.f32 %v1179_v11, %v1181_v12  ;;  %v1186_v3 = vmax.f32 %v1180_v30, %v1182_v2 }
 0x261   :  { %v1192_v58 = vmax.f32 %v1186_v3, %v1188_v18  ;;  %v1191_v5 = vmax.f32 %v1185_v13, %v1187_v15 }
 0x263   :  { %v1212_v8 = vrot.slane %v1192_v58, 7 }
 0x265   :  { %v1214_v9 = vsel %vm1213_vm10, %v1212_v8, %v1191_v5 }
 0x266   :  { %1491 = vmatmul.mubr.msk.f32.vlgmr.msra.gmra.mrb[2].mxu0 %vm335_vm0, %v1214_v9 }
 0x339   :  { %v1283_v22 = vpop.f32.mrb[2].mxu0 }
 0x33a   :  { %v1284_v24 = vadd.f32 %v1393_v10, %v1283_v22  ;;  %v1492_v26 = vpop.f32.mrb[3].mxu0 }
 0x33c   :  { %1288 = vst.msk [vmem:[#allocation2] sm:$0x3] %vm1287_vm11, %v1284_v24 }
 0x33d   :  { %1629 = shalt.err (!%p1626_p4)
}
 0x33e   :  { %s1630_s26 = scalar_lea.hbm %s2568_s9, 32 }
 0x33f   :  { %p1631_p5 = scmp.ne.s32.totalorder %s2568_s9, %s1630_s26  ;;  %p1634_p6 = scmp.lt.u32.totalorder %s1630_s26, %s2568_s9 }
 0x341   :  { %p1636_p7 = pnand %p1634_p6, %p1631_p5 }
 0x343   :  { %1639 = shalt.err (!%p1636_p7)
}
 0x344   :  { %1298 = dma.vmem_to_hbm [thread:$0]  %s1296_s23, 32, %s2568_s9, [#allocation3]  }
 0x345   :  { %1640 = dma.done.wait [#allocation3], 32  }
 0x346   :  { %1641 = vsyncadd [#allocation3], 4294967264 }
 0x347   :  { %1302 = vsyncpa [#allocation3], 1 }

</bundles_post_ra>
